<compile_context>
chip_gen: v5e
topology: v5e:2x2
jax: 0.10.0
libtpu: 0.0.40
codegen_flags: <defaults>
</compile_context>

<pallas_src>
import functools

import numpy as np
import jax
import jax.numpy as jnp
from jax.experimental import pallas as pl
from jax.experimental.pallas import tpu as pltpu

TEM = 30.0
LN_EPS = 1e-5


def _round_up(v, m):
    return (v + m - 1) // m * m


# ---------------------------------------------------------------------------
# Pallas kernel: grid = (node_tiles, edge_tiles); edge axis is the reduction.
# ---------------------------------------------------------------------------
def _en_base_layer_kernel(
    dst_col_ref,                 # [tE, 1]  int32 dst per edge (-1 = pad)
    src_col_ref,                 # [tE, 1]  int32 src per edge (-1 = pad)
    dst_row_ref,                 # [1, tE]  int32 dst per edge (lane layout)
    ed_ref,                      # [tE, 1]  f32   sigmoid(tem / (|rel_x| + 1e-8))
    ga_ref,                      # [Np, Hp] bf16  h @ We1a   (resident)
    gb_ref,                      # [Np, Hp] bf16  h @ We1b   (resident)
    be1_ref,                     # [1, Hp]  f32
    we2_ref, be2_ref,            # [Hp, Hp] bf16, [1, Hp] f32
    wi_ref, bi_ref,              # [1, Hp]  f32,  [1, 1]  f32
    wn1a_ref, bn1_ref,           # [Hp, Hp] bf16, [1, Hp] f32
    wn2_ref, bn2_ref,            # [Hp, Hp] bf16, [1, Hp] f32
    hn_ref,                      # [tileN, Hp] f32  h @ Wn1b (node tile)
    h_ref,                       # [tileN, Hp] f32  residual (node tile)
    gamma_ref, beta_ref,         # [1, Hp]  f32 (zero past true H)
    out_ref,                     # [tileN, Hp] f32  (doubles as mi accumulator)
    *, n_pad, tile_n, h_true,
):
    f32, bf16 = jnp.float32, jnp.bfloat16
    ni = pl.program_id(0)
    ei = pl.program_id(1)

    @pl.when(ei == 0)
    def _init():
        out_ref[...] = jnp.zeros_like(out_ref)

    t_e = dst_col_ref.shape[0]

    # ---- in-kernel gather of pre-projected node features (one-hot @ MXU) ----
    lane_nodes = jax.lax.broadcasted_iota(jnp.int32, (t_e, n_pad), 1)        # [tE, Np]
    oh_dst = (lane_nodes == dst_col_ref[...]).astype(bf16)                   # [tE, Np]
    oh_src = (lane_nodes == src_col_ref[...]).astype(bf16)

    # edge MLP layer 1: relu(hi@W1a + hj@W1b + b1) == relu(oh_dst@Ga + oh_src@Gb + b1)
    m1 = jnp.maximum(
        jnp.dot(oh_dst, ga_ref[...], preferred_element_type=f32)
        + jnp.dot(oh_src, gb_ref[...], preferred_element_type=f32)
        + be1_ref[...], 0.0)
    mij = jnp.maximum(
        jnp.dot(m1.astype(bf16), we2_ref[...], preferred_element_type=f32)
        + be2_ref[...], 0.0)                                                 # [tE, Hp]

    # ---- edge_inf (H -> 1) as a lane reduction + distance / sigmoid gating ----
    eij = jnp.sum(mij * wi_ref[...], axis=-1, keepdims=True) + bi_ref[...]   # [tE, 1]
    edge_w = jax.nn.sigmoid(eij * ed_ref[...])                               # [tE, 1]
    weighted = (mij * edge_w).astype(bf16)                                   # [tE, Hp]

    # ---- scatter-sum over dst into this node tile (lane-dense one-hot) ----
    row_nodes = jax.lax.broadcasted_iota(jnp.int32, (tile_n, t_e), 0) + ni * tile_n
    oh_scat = (row_nodes == dst_row_ref[...]).astype(bf16)                   # [tileN, tE]
    out_ref[...] += jnp.dot(oh_scat, weighted, preferred_element_type=f32)   # [tileN, Hp]

    # ---- last edge tile: node MLP + residual + LayerNorm ----
    @pl.when(ei == pl.num_programs(1) - 1)
    def _finalize():
        mi = out_ref[...]
        n1 = jnp.maximum(
            jnp.dot(mi.astype(bf16), wn1a_ref[...], preferred_element_type=f32)
            + hn_ref[...] + bn1_ref[...], 0.0)
        n2 = jnp.dot(n1.astype(bf16), wn2_ref[...], preferred_element_type=f32) + bn2_ref[...]
        pre = h_ref[...] + n2                      # padded lanes stay exactly 0
        lane = jax.lax.broadcasted_iota(jnp.int32, pre.shape, 1)
        inv_h = 1.0 / float(h_true)
        mean = jnp.sum(pre, axis=-1, keepdims=True) * inv_h
        diff = jnp.where(lane < h_true, pre - mean, 0.0)
        var = jnp.sum(diff * diff, axis=-1, keepdims=True) * inv_h
        out_ref[...] = diff * jax.lax.rsqrt(var + LN_EPS) * gamma_ref[...] + beta_ref[...]


# ---------------------------------------------------------------------------
# Wrapper: XLA glue (geometry, pre-projections, padding) + pallas_call.
# ---------------------------------------------------------------------------
def en_base_layer(h, x, edge_index, params, *, tile_edges=1024, node_tiles=1):
    N, H = h.shape
    src = edge_index[0].astype(jnp.int32)
    dst = edge_index[1].astype(jnp.int32)
    E = src.shape[0]

    f32, bf16 = jnp.float32, jnp.bfloat16
    Hp = _round_up(max(H, 128), 128)                     # lane-dense hidden dim
    nt = max(int(node_tiles), 1)
    tileN = _round_up(-(-N // nt), 8)                    # sublane-aligned node tile
    Np = tileN * nt

    tE = max(128, _round_up(min(tile_edges, E), 128))    # lane-dense edge tile
    E_pad = _round_up(E, tE)
    n_edge_tiles = E_pad // tE

    h32 = h.astype(f32)

    # ---- cheap per-edge geometry stays in XLA (lane-sparse 3-vector work) ----
    rel_x = (x[dst] - x[src]).astype(f32)
    d_sq = jnp.sum(rel_x ** 2, axis=-1, keepdims=True)
    # zero-distance edges saturate to 1.0 — same as the PyTorch reference
    edge_dis = jax.nn.sigmoid(TEM / (jnp.sqrt(d_sq) + 1e-8))                 # [E, 1]

    # ---- one-time node pre-projections (replace per-edge hi/hj HBM streams) ----
    we1a, we1b = params["we1"][:H].astype(f32), params["we1"][H:].astype(f32)
    wn1a, wn1b = params["wn1"][:H].astype(f32), params["wn1"][H:].astype(f32)
    ga = h32 @ we1a                                      # [N, H]
    gb = h32 @ we1b
    hn = h32 @ wn1b

    def pad_nodes(a, dtype):                             # [N, H] -> [Np, Hp]
        return jnp.pad(a, ((0, Np - N), (0, Hp - H))).astype(dtype)

    def pad_mat(w):                                      # [H, H] -> [Hp, Hp] bf16
        return jnp.pad(w.astype(f32), ((0, Hp - w.shape[0]), (0, Hp - w.shape[1]))).astype(bf16)

    def pad_row(v):                                      # [H] -> [1, Hp] f32
        return jnp.pad(v.astype(f32), (0, Hp - v.shape[0])).reshape(1, Hp)

    dst_col = jnp.pad(dst, (0, E_pad - E), constant_values=-1).reshape(E_pad, 1)
    src_col = jnp.pad(src, (0, E_pad - E), constant_values=-1).reshape(E_pad, 1)
    dst_row = dst_col.reshape(1, E_pad)
    ed_col = jnp.pad(edge_dis, ((0, E_pad - E), (0, 0)))

    args = (
        dst_col, src_col, dst_row, ed_col,
        pad_nodes(ga, bf16), pad_nodes(gb, bf16),
        pad_row(params["be1"]),
        pad_mat(params["we2"]), pad_row(params["be2"]),
        pad_row(params["wi"]), params["bi"].astype(f32).reshape(1, 1),
        pad_mat(wn1a), pad_row(params["bn1"]),
        pad_mat(params["wn2"]), pad_row(params["bn2"]),
        pad_nodes(hn, f32), pad_nodes(h32, f32),
        pad_row(params["gamma"]), pad_row(params["beta"]),
    )

    col_spec = pl.BlockSpec((tE, 1), lambda ni, ei: (ei, 0))
    row_spec = pl.BlockSpec((1, tE), lambda ni, ei: (0, ei))
    node_spec = pl.BlockSpec((tileN, Hp), lambda ni, ei: (ni, 0))

    def full(shape):
        return pl.BlockSpec(shape, lambda ni, ei: (0, 0))

    in_specs = [
        col_spec, col_spec, row_spec, col_spec,          # dst_col, src_col, dst_row, edge_dis
        full((Np, Hp)), full((Np, Hp)),                  # ga, gb (resident)
        full((1, Hp)),                                   # be1
        full((Hp, Hp)), full((1, Hp)),                   # we2, be2
        full((1, Hp)), full((1, 1)),                     # wi, bi
        full((Hp, Hp)), full((1, Hp)),                   # wn1a, bn1
        full((Hp, Hp)), full((1, Hp)),                   # wn2, bn2
        node_spec, node_spec,                            # hn, h (node tiles)
        full((1, Hp)), full((1, Hp)),                    # gamma, beta
    ]

    # ---- VMEM budget: sum(buffer_count * block_bytes) + live temporaries ----
    blk_bytes = (
        4 * tE * 4                                       # per-edge index / gating streams
        + 2 * Np * Hp * 2                                # ga, gb (bf16)
        + 3 * Hp * Hp * 2                                # we2, wn1a, wn2 (bf16)
        + 7 * Hp * 4 + 4                                 # bias/affine rows + bi
        + 2 * tileN * Hp * 4                             # hn, h (f32)
        + tileN * Hp * 4                                 # out block
    )
    tmp_bytes = (
        2 * tE * Np * 2 + tileN * tE * 2                 # gather / scatter one-hots (bf16)
        + 3 * tE * Hp * 4                                # m1 / mij / weighted
        + 4 * tileN * Hp * 4                             # finalize temporaries
    )
    vmem_bytes = int(2 * blk_bytes + 2 * tmp_bytes) + (2 << 20)
    vmem_bytes = min(max(vmem_bytes, 32 << 20), 96 << 20)

    kernel = functools.partial(_en_base_layer_kernel, n_pad=Np, tile_n=tileN, h_true=H)
    out_pad = pl.pallas_call(
        kernel,
        out_shape=jax.ShapeDtypeStruct((Np, Hp), f32),
        grid_spec=pltpu.PrefetchScalarGridSpec(
            num_scalar_prefetch=0,
            grid=(nt, n_edge_tiles),
            in_specs=in_specs,
            out_specs=pl.BlockSpec((tileN, Hp), lambda ni, ei: (ni, 0)),
        ),
        compiler_params=pltpu.CompilerParams(
            dimension_semantics=("parallel", "arbitrary"),
            vmem_limit_bytes=vmem_bytes,
        ),
    )(*args)
    return out_pad[:N, :H].astype(h.dtype), x


# ---------------------------------------------------------------------------
# Pure-JAX f32 reference (mirrors the PyTorch forward exactly).
# ---------------------------------------------------------------------------
def reference(h, x, edge_index, p):
    src, dst = edge_index[0], edge_index[1]
    N, H = h.shape
    hi, hj = h[dst], h[src]
    rel_x = x[dst] - x[src]
    d_sq = jnp.sum(rel_x ** 2, -1, keepdims=True)
    hcat = jnp.concatenate([hi, hj], -1)
    m1 = jax.nn.relu(hcat @ p["we1"] + p["be1"])
    mij = jax.nn.relu(m1 @ p["we2"] + p["be2"])
    eij = mij @ p["wi"].reshape(H, 1) + p["bi"]
    edge_dis = jax.nn.sigmoid(TEM / (jnp.sqrt(d_sq) + 1e-8))
    w = jax.nn.sigmoid(eij * edge_dis)
    mi = jax.ops.segment_sum(mij * w, dst, num_segments=N)
    ncat = jnp.concatenate([mi, h], -1)
    n1 = jax.nn.relu(ncat @ p["wn1"] + p["bn1"])
    n2 = n1 @ p["wn2"] + p["bn2"]
    pre = h + n2
    mean = pre.mean(-1, keepdims=True)
    var = ((pre - mean) ** 2).mean(-1, keepdims=True)
    return (pre - mean) / jnp.sqrt(var + LN_EPS) * p["gamma"] + p["beta"], x


def make_params(key, H):
    ks = jax.random.split(key, 12)
    s = 0.1
    return {
        "we1": s * jax.random.normal(ks[0], (2 * H, H), jnp.float32),
        "be1": s * jax.random.normal(ks[1], (H,), jnp.float32),
        "we2": s * jax.random.normal(ks[2], (H, H), jnp.float32),
        "be2": s * jax.random.normal(ks[3], (H,), jnp.float32),
        "wi":  s * jax.random.normal(ks[4], (H,), jnp.float32),
        "bi":  s * jax.random.normal(ks[5], (1,), jnp.float32),
        "wn1": s * jax.random.normal(ks[6], (2 * H, H), jnp.float32),
        "bn1": s * jax.random.normal(ks[7], (H,), jnp.float32),
        "wn2": s * jax.random.normal(ks[8], (H, H), jnp.float32),
        "bn2": s * jax.random.normal(ks[9], (H,), jnp.float32),
        "gamma": jnp.ones((H,), jnp.float32)
                 + 0.01 * jax.random.normal(ks[10], (H,), jnp.float32),
        "beta": 0.01 * jax.random.normal(ks[11], (H,), jnp.float32),
    }


if __name__ == "__main__":
    N, H, E = 16, 32, 300  # nodes, hidden_dim, edges

    key = jax.random.PRNGKey(0)
    k_h, k_x, k_src, k_dst, k_p = jax.random.split(key, 5)

    h = jax.random.normal(k_h, (N, H), jnp.float32)
    x = jax.random.normal(k_x, (N, 3), jnp.float32)
    src = jax.random.randint(k_src, (E,), 0, N, jnp.int32)
    dst = jax.random.randint(k_dst, (E,), 0, N, jnp.int32)
    edge_index = jnp.stack([src, dst], axis=0)
    params = make_params(k_p, H)

    h_ref, _ = reference(h, x, edge_index, params)

    # (tile_edges=128, nt=1)  -> 3 edge tiles: exercises the accumulator pipeline
    # (tile_edges=1024, nt=1) -> single edge tile
    # (tile_edges=128, nt=2)  -> node-tiled ("parallel") leading grid axis
    for t_e, nt in ((128, 1), (1024, 1), (128, 2)):
        h_out, x_out = en_base_layer(h, x, edge_index, params,
                                     tile_edges=t_e, node_tiles=nt)
        jax.block_until_ready(h_out)
        np.testing.assert_allclose(np.asarray(h_out), np.asarray(h_ref),
                                   rtol=2e-2, atol=2e-2)
        assert x_out.shape == x.shape

    print("KERNEL_OK")
</pallas_src>

<mosaic_0001>
module attributes {stable_mosaic.version = 11 : i64} {
  func.func @_en_base_layer_kernel(%arg0: i32, %arg1: i32, %arg2: memref<128x1xi32, #tpu.memory_space<vmem>>, %arg3: memref<128x1xi32, #tpu.memory_space<vmem>>, %arg4: memref<1x128xi32, #tpu.memory_space<vmem>>, %arg5: memref<128x1xf32, #tpu.memory_space<vmem>>, %arg6: memref<16x128xbf16, #tpu.memory_space<vmem>>, %arg7: memref<16x128xbf16, #tpu.memory_space<vmem>>, %arg8: memref<1x128xf32, #tpu.memory_space<vmem>>, %arg9: memref<128x128xbf16, #tpu.memory_space<vmem>>, %arg10: memref<1x128xf32, #tpu.memory_space<vmem>>, %arg11: memref<1x128xf32, #tpu.memory_space<vmem>>, %arg12: memref<1x1xf32, #tpu.memory_space<vmem>>, %arg13: memref<128x128xbf16, #tpu.memory_space<vmem>>, %arg14: memref<1x128xf32, #tpu.memory_space<vmem>>, %arg15: memref<128x128xbf16, #tpu.memory_space<vmem>>, %arg16: memref<1x128xf32, #tpu.memory_space<vmem>>, %arg17: memref<16x128xf32, #tpu.memory_space<vmem>>, %arg18: memref<16x128xf32, #tpu.memory_space<vmem>>, %arg19: memref<1x128xf32, #tpu.memory_space<vmem>>, %arg20: memref<1x128xf32, #tpu.memory_space<vmem>>, %arg21: memref<16x128xf32, #tpu.memory_space<vmem>>) attributes {dimension_semantics = [#tpu.dimension_semantics<parallel>, #tpu.dimension_semantics<arbitrary>], iteration_bounds = array<i64: 1, 3>, scalar_prefetch = 0 : i64, scratch_operands = 0 : i64, tpu.core_type = #tpu.core_type<tc>, window_params = [{transform_indices = @transform_0, window_bounds = array<i64: 128, 1>}, {transform_indices = @transform_1, window_bounds = array<i64: 128, 1>}, {transform_indices = @transform_2, window_bounds = array<i64: 1, 128>}, {transform_indices = @transform_3, window_bounds = array<i64: 128, 1>}, {pipeline_mode = #tpu.pipeline_mode<synchronous>, transform_indices = @transform_4, window_bounds = array<i64: 16, 128>}, {pipeline_mode = #tpu.pipeline_mode<synchronous>, transform_indices = @transform_5, window_bounds = array<i64: 16, 128>}, {pipeline_mode = #tpu.pipeline_mode<synchronous>, transform_indices = @transform_6, window_bounds = array<i64: 1, 128>}, {pipeline_mode = #tpu.pipeline_mode<synchronous>, transform_indices = @transform_7, window_bounds = array<i64: 128, 128>}, {pipeline_mode = #tpu.pipeline_mode<synchronous>, transform_indices = @transform_8, window_bounds = array<i64: 1, 128>}, {pipeline_mode = #tpu.pipeline_mode<synchronous>, transform_indices = @transform_9, window_bounds = array<i64: 1, 128>}, {pipeline_mode = #tpu.pipeline_mode<synchronous>, transform_indices = @transform_10, window_bounds = array<i64: 1, 1>}, {pipeline_mode = #tpu.pipeline_mode<synchronous>, transform_indices = @transform_11, window_bounds = array<i64: 128, 128>}, {pipeline_mode = #tpu.pipeline_mode<synchronous>, transform_indices = @transform_12, window_bounds = array<i64: 1, 128>}, {pipeline_mode = #tpu.pipeline_mode<synchronous>, transform_indices = @transform_13, window_bounds = array<i64: 128, 128>}, {pipeline_mode = #tpu.pipeline_mode<synchronous>, transform_indices = @transform_14, window_bounds = array<i64: 1, 128>}, {transform_indices = @transform_15, window_bounds = array<i64: 16, 128>}, {transform_indices = @transform_16, window_bounds = array<i64: 16, 128>}, {pipeline_mode = #tpu.pipeline_mode<synchronous>, transform_indices = @transform_17, window_bounds = array<i64: 1, 128>}, {pipeline_mode = #tpu.pipeline_mode<synchronous>, transform_indices = @transform_18, window_bounds = array<i64: 1, 128>}, {transform_indices = @transform_19, window_bounds = array<i64: 16, 128>}]} {
    %c0_i32 = arith.constant 0 : i32
    %0 = arith.cmpi eq, %arg1, %c0_i32 : i32
    %1 = arith.extui %0 : i1 to i32
    %c0_i32_0 = arith.constant 0 : i32
    %2 = arith.cmpi ne, %1, %c0_i32_0 : i32
    scf.if %2 {
      %cst_34 = arith.constant 0.000000e+00 : f32
      %69 = vector.broadcast %cst_34 : f32 to vector<16x128xf32>
      %c0_35 = arith.constant 0 : index
      %c0_36 = arith.constant 0 : index
      %70 = vector.load %arg21[%c0_35, %c0_36] : memref<16x128xf32, #tpu.memory_space<vmem>>, vector<16x128xf32>
      tpu.vector_store %arg21[%c0_35, %c0_36], %69 {strides = array<i32>} : memref<16x128xf32, #tpu.memory_space<vmem>>, vector<16x128xf32>,
    } else {
    }
    %3 = tpu.iota {dimensions = array<i32: 1>} : vector<128x16xi32>
    %c0 = arith.constant 0 : index
    %c0_1 = arith.constant 0 : index
    %4 = vector.load %arg2[%c0, %c0_1] : memref<128x1xi32, #tpu.memory_space<vmem>>, vector<128x1xi32>
    %5 = vector.broadcast %4 : vector<128x1xi32> to vector<128x16xi32>
    %6 = arith.cmpi eq, %3, %5 : vector<128x16xi32>
    %7 = arith.extui %6 : vector<128x16xi1> to vector<128x16xi32>
    %8 = arith.sitofp %7 : vector<128x16xi32> to vector<128x16xf32>
    %9 = arith.truncf %8 : vector<128x16xf32> to vector<128x16xbf16>
    %c0_2 = arith.constant 0 : index
    %c0_3 = arith.constant 0 : index
    %10 = vector.load %arg3[%c0_2, %c0_3] : memref<128x1xi32, #tpu.memory_space<vmem>>, vector<128x1xi32>
    %11 = vector.broadcast %10 : vector<128x1xi32> to vector<128x16xi32>
    %12 = arith.cmpi eq, %3, %11 : vector<128x16xi32>
    %13 = arith.extui %12 : vector<128x16xi1> to vector<128x16xi32>
    %14 = arith.sitofp %13 : vector<128x16xi32> to vector<128x16xf32>
    %15 = arith.truncf %14 : vector<128x16xf32> to vector<128x16xbf16>
    %c0_4 = arith.constant 0 : index
    %c0_5 = arith.constant 0 : index
    %16 = vector.load %arg6[%c0_4, %c0_5] : memref<16x128xbf16, #tpu.memory_space<vmem>>, vector<16x128xbf16>
    %cst = arith.constant dense<0.000000e+00> : vector<128x128xf32>
    %17 = tpu.matmul %9, %16, %cst {dimension_numbers = #tpu.dot_dimension_numbers<[1], [0], [0], [1], [0, 0, 1, 1], [], []>} : vector<128x16xbf16>, vector<16x128xbf16>, vector<128x128xf32> -> vector<128x128xf32>
    %c0_6 = arith.constant 0 : index
    %c0_7 = arith.constant 0 : index
    %18 = vector.load %arg7[%c0_6, %c0_7] : memref<16x128xbf16, #tpu.memory_space<vmem>>, vector<16x128xbf16>
    %cst_8 = arith.constant dense<0.000000e+00> : vector<128x128xf32>
    %19 = tpu.matmul %15, %18, %cst_8 {dimension_numbers = #tpu.dot_dimension_numbers<[1], [0], [0], [1], [0, 0, 1, 1], [], []>} : vector<128x16xbf16>, vector<16x128xbf16>, vector<128x128xf32> -> vector<128x128xf32>
    %20 = arith.addf %17, %19 : vector<128x128xf32>
    %c0_9 = arith.constant 0 : index
    %c0_10 = arith.constant 0 : index
    %21 = vector.load %arg8[%c0_9, %c0_10] : memref<1x128xf32, #tpu.memory_space<vmem>>, vector<1x128xf32>
    %22 = vector.broadcast %21 : vector<1x128xf32> to vector<128x128xf32>
    %23 = arith.addf %20, %22 : vector<128x128xf32>
    %cst_11 = arith.constant 0.000000e+00 : f32
    %24 = vector.broadcast %cst_11 : f32 to vector<128x128xf32>
    %25 = arith.maximumf %23, %24 : vector<128x128xf32>
    %26 = arith.truncf %25 : vector<128x128xf32> to vector<128x128xbf16>
    %c0_12 = arith.constant 0 : index
    %c0_13 = arith.constant 0 : index
    %27 = vector.load %arg9[%c0_12, %c0_13] : memref<128x128xbf16, #tpu.memory_space<vmem>>, vector<128x128xbf16>
    %cst_14 = arith.constant dense<0.000000e+00> : vector<128x128xf32>
    %28 = tpu.matmul %26, %27, %cst_14 {dimension_numbers = #tpu.dot_dimension_numbers<[1], [0], [0], [1], [0, 0, 1, 1], [], []>} : vector<128x128xbf16>, vector<128x128xbf16>, vector<128x128xf32> -> vector<128x128xf32>
    %c0_15 = arith.constant 0 : index
    %c0_16 = arith.constant 0 : index
    %29 = vector.load %arg10[%c0_15, %c0_16] : memref<1x128xf32, #tpu.memory_space<vmem>>, vector<1x128xf32>
    %30 = vector.broadcast %29 : vector<1x128xf32> to vector<128x128xf32>
    %31 = arith.addf %28, %30 : vector<128x128xf32>
    %cst_17 = arith.constant 0.000000e+00 : f32
    %32 = vector.broadcast %cst_17 : f32 to vector<128x128xf32>
    %33 = arith.maximumf %31, %32 : vector<128x128xf32>
    %c0_18 = arith.constant 0 : index
    %c0_19 = arith.constant 0 : index
    %34 = vector.load %arg11[%c0_18, %c0_19] : memref<1x128xf32, #tpu.memory_space<vmem>>, vector<1x128xf32>
    %35 = vector.broadcast %34 : vector<1x128xf32> to vector<128x128xf32>
    %36 = arith.mulf %33, %35 : vector<128x128xf32>
    %cst_20 = arith.constant dense<0.000000e+00> : vector<128xf32>
    %37 = vector.multi_reduction <add>, %36, %cst_20 [1] : vector<128x128xf32> to vector<128xf32>
    %38 = vector.shape_cast %37 : vector<128xf32> to vector<128x1xf32>
    %c0_21 = arith.constant 0 : index
    %c0_22 = arith.constant 0 : index
    %39 = vector.load %arg12[%c0_21, %c0_22] : memref<1x1xf32, #tpu.memory_space<vmem>>, vector<1x1xf32>
    %40 = vector.broadcast %39 : vector<1x1xf32> to vector<128x1xf32>
    %41 = arith.addf %38, %40 : vector<128x1xf32>
    %c0_23 = arith.constant 0 : index
    %c0_24 = arith.constant 0 : index
    %42 = vector.load %arg5[%c0_23, %c0_24] : memref<128x1xf32, #tpu.memory_space<vmem>>, vector<128x1xf32>
    %43 = arith.mulf %41, %42 : vector<128x1xf32>
    %44 = arith.negf %43 : vector<128x1xf32>
    %45 = math.exp %44 : vector<128x1xf32>
    %cst_25 = arith.constant 1.000000e+00 : f32
    %46 = vector.broadcast %cst_25 : f32 to vector<128x1xf32>
    %47 = arith.addf %46, %45 : vector<128x1xf32>
    %48 = arith.divf %46, %47 : vector<128x1xf32>
    %49 = vector.broadcast %48 : vector<128x1xf32> to vector<128x128xf32>
    %50 = arith.mulf %33, %49 : vector<128x128xf32>
    %51 = arith.truncf %50 : vector<128x128xf32> to vector<128x128xbf16>
    %52 = tpu.iota {dimensions = array<i32: 0>} : vector<16x128xi32>
    %c16_i32 = arith.constant 16 : i32
    %53 = arith.muli %arg0, %c16_i32 : i32
    %54 = vector.broadcast %53 : i32 to vector<16x128xi32>
    %55 = arith.addi %52, %54 : vector<16x128xi32>
    %c0_26 = arith.constant 0 : index
    %c0_27 = arith.constant 0 : index
    %56 = vector.load %arg4[%c0_26, %c0_27] : memref<1x128xi32, #tpu.memory_space<vmem>>, vector<1x128xi32>
    %57 = vector.broadcast %56 : vector<1x128xi32> to vector<16x128xi32>
    %58 = arith.cmpi eq, %55, %57 : vector<16x128xi32>
    %59 = arith.extui %58 : vector<16x128xi1> to vector<16x128xi32>
    %60 = arith.sitofp %59 : vector<16x128xi32> to vector<16x128xf32>
    %61 = arith.truncf %60 : vector<16x128xf32> to vector<16x128xbf16>
    %c0_28 = arith.constant 0 : index
    %c0_29 = arith.constant 0 : index
    %62 = vector.load %arg21[%c0_28, %c0_29] : memref<16x128xf32, #tpu.memory_space<vmem>>, vector<16x128xf32>
    %cst_30 = arith.constant dense<0.000000e+00> : vector<16x128xf32>
    %63 = tpu.matmul %61, %51, %cst_30 {dimension_numbers = #tpu.dot_dimension_numbers<[1], [0], [0], [1], [0, 0, 1, 1], [], []>} : vector<16x128xbf16>, vector<128x128xbf16>, vector<16x128xf32> -> vector<16x128xf32>
    %64 = arith.addf %62, %63 : vector<16x128xf32>
    %c0_31 = arith.constant 0 : index
    %c0_32 = arith.constant 0 : index
    %65 = vector.load %arg21[%c0_31, %c0_32] : memref<16x128xf32, #tpu.memory_space<vmem>>, vector<16x128xf32>
    tpu.vector_store %arg21[%c0_31, %c0_32], %64 {strides = array<i32>} : memref<16x128xf32, #tpu.memory_space<vmem>>, vector<16x128xf32>,
    %c2_i32 = arith.constant 2 : i32
    %66 = arith.cmpi eq, %arg1, %c2_i32 : i32
    %67 = arith.extui %66 : i1 to i32
    %c0_i32_33 = arith.constant 0 : i32
    %68 = arith.cmpi ne, %67, %c0_i32_33 : i32
    scf.if %68 {
      %c0_34 = arith.constant 0 : index
      %c0_35 = arith.constant 0 : index
      %69 = vector.load %arg21[%c0_34, %c0_35] : memref<16x128xf32, #tpu.memory_space<vmem>>, vector<16x128xf32>
      %70 = arith.truncf %69 : vector<16x128xf32> to vector<16x128xbf16>
      %c0_36 = arith.constant 0 : index
      %c0_37 = arith.constant 0 : index
      %71 = vector.load %arg13[%c0_36, %c0_37] : memref<128x128xbf16, #tpu.memory_space<vmem>>, vector<128x128xbf16>
      %cst_38 = arith.constant dense<0.000000e+00> : vector<16x128xf32>
      %72 = tpu.matmul %70, %71, %cst_38 {dimension_numbers = #tpu.dot_dimension_numbers<[1], [0], [0], [1], [0, 0, 1, 1], [], []>} : vector<16x128xbf16>, vector<128x128xbf16>, vector<16x128xf32> -> vector<16x128xf32>
      %c0_39 = arith.constant 0 : index
      %c0_40 = arith.constant 0 : index
      %73 = vector.load %arg17[%c0_39, %c0_40] : memref<16x128xf32, #tpu.memory_space<vmem>>, vector<16x128xf32>
      %74 = arith.addf %72, %73 : vector<16x128xf32>
      %c0_41 = arith.constant 0 : index
      %c0_42 = arith.constant 0 : index
      %75 = vector.load %arg14[%c0_41, %c0_42] : memref<1x128xf32, #tpu.memory_space<vmem>>, vector<1x128xf32>
      %76 = vector.broadcast %75 : vector<1x128xf32> to vector<16x128xf32>
      %77 = arith.addf %74, %76 : vector<16x128xf32>
      %cst_43 = arith.constant 0.000000e+00 : f32
      %78 = vector.broadcast %cst_43 : f32 to vector<16x128xf32>
      %79 = arith.maximumf %77, %78 : vector<16x128xf32>
      %80 = arith.truncf %79 : vector<16x128xf32> to vector<16x128xbf16>
      %c0_44 = arith.constant 0 : index
      %c0_45 = arith.constant 0 : index
      %81 = vector.load %arg15[%c0_44, %c0_45] : memref<128x128xbf16, #tpu.memory_space<vmem>>, vector<128x128xbf16>
      %cst_46 = arith.constant dense<0.000000e+00> : vector<16x128xf32>
      %82 = tpu.matmul %80, %81, %cst_46 {dimension_numbers = #tpu.dot_dimension_numbers<[1], [0], [0], [1], [0, 0, 1, 1], [], []>} : vector<16x128xbf16>, vector<128x128xbf16>, vector<16x128xf32> -> vector<16x128xf32>
      %c0_47 = arith.constant 0 : index
      %c0_48 = arith.constant 0 : index
      %83 = vector.load %arg16[%c0_47, %c0_48] : memref<1x128xf32, #tpu.memory_space<vmem>>, vector<1x128xf32>
      %84 = vector.broadcast %83 : vector<1x128xf32> to vector<16x128xf32>
      %85 = arith.addf %82, %84 : vector<16x128xf32>
      %c0_49 = arith.constant 0 : index
      %c0_50 = arith.constant 0 : index
      %86 = vector.load %arg18[%c0_49, %c0_50] : memref<16x128xf32, #tpu.memory_space<vmem>>, vector<16x128xf32>
      %87 = arith.addf %86, %85 : vector<16x128xf32>
      %88 = tpu.iota {dimensions = array<i32: 1>} : vector<16x128xi32>
      %cst_51 = arith.constant dense<0.000000e+00> : vector<16xf32>
      %89 = vector.multi_reduction <add>, %87, %cst_51 [1] : vector<16x128xf32> to vector<16xf32>
      %90 = vector.shape_cast %89 : vector<16xf32> to vector<16x1xf32>
      %cst_52 = arith.constant 3.125000e-02 : f32
      %91 = vector.broadcast %cst_52 : f32 to vector<16x1xf32>
      %92 = arith.mulf %90, %91 : vector<16x1xf32>
      %c32_i32 = arith.constant 32 : i32
      %93 = vector.broadcast %c32_i32 : i32 to vector<16x128xi32>
      %94 = arith.cmpi slt, %88, %93 : vector<16x128xi32>
      %95 = vector.broadcast %92 : vector<16x1xf32> to vector<16x128xf32>
      %96 = arith.subf %87, %95 : vector<16x128xf32>
      %cst_53 = arith.constant 0.000000e+00 : f32
      %97 = vector.broadcast %cst_53 : f32 to vector<16x128xf32>
      %98 = arith.select %94, %96, %97 : vector<16x128xi1>, vector<16x128xf32>
      %99 = arith.mulf %98, %98 : vector<16x128xf32>
      %cst_54 = arith.constant dense<0.000000e+00> : vector<16xf32>
      %100 = vector.multi_reduction <add>, %99, %cst_54 [1] : vector<16x128xf32> to vector<16xf32>
      %101 = vector.shape_cast %100 : vector<16xf32> to vector<16x1xf32>
      %cst_55 = arith.constant 3.125000e-02 : f32
      %102 = vector.broadcast %cst_55 : f32 to vector<16x1xf32>
      %103 = arith.mulf %101, %102 : vector<16x1xf32>
      %cst_56 = arith.constant 9.99999974E-6 : f32
      %104 = vector.broadcast %cst_56 : f32 to vector<16x1xf32>
      %105 = arith.addf %103, %104 : vector<16x1xf32>
      %106 = math.rsqrt %105 : vector<16x1xf32>
      %107 = vector.broadcast %106 : vector<16x1xf32> to vector<16x128xf32>
      %108 = arith.mulf %98, %107 : vector<16x128xf32>
      %c0_57 = arith.constant 0 : index
      %c0_58 = arith.constant 0 : index
      %109 = vector.load %arg19[%c0_57, %c0_58] : memref<1x128xf32, #tpu.memory_space<vmem>>, vector<1x128xf32>
      %110 = vector.broadcast %109 : vector<1x128xf32> to vector<16x128xf32>
      %111 = arith.mulf %108, %110 : vector<16x128xf32>
      %c0_59 = arith.constant 0 : index
      %c0_60 = arith.constant 0 : index
      %112 = vector.load %arg20[%c0_59, %c0_60] : memref<1x128xf32, #tpu.memory_space<vmem>>, vector<1x128xf32>
      %113 = vector.broadcast %112 : vector<1x128xf32> to vector<16x128xf32>
      %114 = arith.addf %111, %113 : vector<16x128xf32>
      %c0_61 = arith.constant 0 : index
      %c0_62 = arith.constant 0 : index
      %115 = vector.load %arg21[%c0_61, %c0_62] : memref<16x128xf32, #tpu.memory_space<vmem>>, vector<16x128xf32>
      tpu.vector_store %arg21[%c0_61, %c0_62], %114 {strides = array<i32>} : memref<16x128xf32, #tpu.memory_space<vmem>>, vector<16x128xf32>,
    } else {
    }
    return
  }
  func.func @transform_0(%arg0: i32, %arg1: i32) -> (i32, i32) {
    %c0_i32 = arith.constant 0 : i32
    %c0_i32_0 = arith.constant 0 : i32
    return %arg1, %c0_i32 : i32, i32
  }
  func.func @transform_1(%arg0: i32, %arg1: i32) -> (i32, i32) {
    %c0_i32 = arith.constant 0 : i32
    %c0_i32_0 = arith.constant 0 : i32
    return %arg1, %c0_i32 : i32, i32
  }
  func.func @transform_2(%arg0: i32, %arg1: i32) -> (i32, i32) {
    %c0_i32 = arith.constant 0 : i32
    %c0_i32_0 = arith.constant 0 : i32
    return %c0_i32, %arg1 : i32, i32
  }
  func.func @transform_3(%arg0: i32, %arg1: i32) -> (i32, i32) {
    %c0_i32 = arith.constant 0 : i32
    %c0_i32_0 = arith.constant 0 : i32
    return %arg1, %c0_i32 : i32, i32
  }
  func.func @transform_4(%arg0: i32, %arg1: i32) -> (i32, i32) {
    %c0_i32 = arith.constant 0 : i32
    %c0_i32_0 = arith.constant 0 : i32
    %c0_i32_1 = arith.constant 0 : i32
    return %c0_i32, %c0_i32_0 : i32, i32
  }
  func.func @transform_5(%arg0: i32, %arg1: i32) -> (i32, i32) {
    %c0_i32 = arith.constant 0 : i32
    %c0_i32_0 = arith.constant 0 : i32
    %c0_i32_1 = arith.constant 0 : i32
    return %c0_i32, %c0_i32_0 : i32, i32
  }
  func.func @transform_6(%arg0: i32, %arg1: i32) -> (i32, i32) {
    %c0_i32 = arith.constant 0 : i32
    %c0_i32_0 = arith.constant 0 : i32
    %c0_i32_1 = arith.constant 0 : i32
    return %c0_i32, %c0_i32_0 : i32, i32
  }
  func.func @transform_7(%arg0: i32, %arg1: i32) -> (i32, i32) {
    %c0_i32 = arith.constant 0 : i32
    %c0_i32_0 = arith.constant 0 : i32
    %c0_i32_1 = arith.constant 0 : i32
    return %c0_i32, %c0_i32_0 : i32, i32
  }
  func.func @transform_8(%arg0: i32, %arg1: i32) -> (i32, i32) {
    %c0_i32 = arith.constant 0 : i32
    %c0_i32_0 = arith.constant 0 : i32
    %c0_i32_1 = arith.constant 0 : i32
    return %c0_i32, %c0_i32_0 : i32, i32
  }
  func.func @transform_9(%arg0: i32, %arg1: i32) -> (i32, i32) {
    %c0_i32 = arith.constant 0 : i32
    %c0_i32_0 = arith.constant 0 : i32
    %c0_i32_1 = arith.constant 0 : i32
    return %c0_i32, %c0_i32_0 : i32, i32
  }
  func.func @transform_10(%arg0: i32, %arg1: i32) -> (i32, i32) {
    %c0_i32 = arith.constant 0 : i32
    %c0_i32_0 = arith.constant 0 : i32
    %c0_i32_1 = arith.constant 0 : i32
    return %c0_i32, %c0_i32_0 : i32, i32
  }
  func.func @transform_11(%arg0: i32, %arg1: i32) -> (i32, i32) {
    %c0_i32 = arith.constant 0 : i32
    %c0_i32_0 = arith.constant 0 : i32
    %c0_i32_1 = arith.constant 0 : i32
    return %c0_i32, %c0_i32_0 : i32, i32
  }
  func.func @transform_12(%arg0: i32, %arg1: i32) -> (i32, i32) {
    %c0_i32 = arith.constant 0 : i32
    %c0_i32_0 = arith.constant 0 : i32
    %c0_i32_1 = arith.constant 0 : i32
    return %c0_i32, %c0_i32_0 : i32, i32
  }
  func.func @transform_13(%arg0: i32, %arg1: i32) -> (i32, i32) {
    %c0_i32 = arith.constant 0 : i32
    %c0_i32_0 = arith.constant 0 : i32
    %c0_i32_1 = arith.constant 0 : i32
    return %c0_i32, %c0_i32_0 : i32, i32
  }
  func.func @transform_14(%arg0: i32, %arg1: i32) -> (i32, i32) {
    %c0_i32 = arith.constant 0 : i32
    %c0_i32_0 = arith.constant 0 : i32
    %c0_i32_1 = arith.constant 0 : i32
    return %c0_i32, %c0_i32_0 : i32, i32
  }
  func.func @transform_15(%arg0: i32, %arg1: i32) -> (i32, i32) {
    %c0_i32 = arith.constant 0 : i32
    %c0_i32_0 = arith.constant 0 : i32
    return %arg0, %c0_i32 : i32, i32
  }
  func.func @transform_16(%arg0: i32, %arg1: i32) -> (i32, i32) {
    %c0_i32 = arith.constant 0 : i32
    %c0_i32_0 = arith.constant 0 : i32
    return %arg0, %c0_i32 : i32, i32
  }
  func.func @transform_17(%arg0: i32, %arg1: i32) -> (i32, i32) {
    %c0_i32 = arith.constant 0 : i32
    %c0_i32_0 = arith.constant 0 : i32
    %c0_i32_1 = arith.constant 0 : i32
    return %c0_i32, %c0_i32_0 : i32, i32
  }
  func.func @transform_18(%arg0: i32, %arg1: i32) -> (i32, i32) {
    %c0_i32 = arith.constant 0 : i32
    %c0_i32_0 = arith.constant 0 : i32
    %c0_i32_1 = arith.constant 0 : i32
    return %c0_i32, %c0_i32_0 : i32, i32
  }
  func.func @transform_19(%arg0: i32, %arg1: i32) -> (i32, i32) {
    %c0_i32 = arith.constant 0 : i32
    %c0_i32_0 = arith.constant 0 : i32
    return %arg0, %c0_i32 : i32, i32
  }
}

</mosaic_0001>

<bundles_post_ra>
// kernel: tpu_custom_call.1
= control target key start
LH: loop header
LB: loop body
LE: loop exit
PB: predicated region body
PF: predicated region fallthrough
CT: control target
= control target key end

     0   :  { %s3408_s0 = inlined_call_operand.vmem [shape: s32[384,1], index: 0, kind: input, shape index: {}]   ;;  %s3409_s1 = inlined_call_operand.vmem [shape: s32[384,1], index: 1, kind: input, shape index: {}]   ;;  %s3410_s2 = inlined_call_operand.vmem [shape: s32[1,384], index: 2, kind: input, shape index: {}]   ;;  %s3411_s3 = inlined_call_operand.vmem [shape: f32[384,1], index: 3, kind: input, shape index: {}]   ;;  %s3412_s4 = inlined_call_operand.vmem [shape: bf16[16,128], index: 4, kind: input, shape index: {}]   ;;  %s3413_s5 = inlined_call_operand.vmem [shape: bf16[16,128], index: 5, kind: input, shape index: {}]   ;;  %s3414_s6 = inlined_call_operand.vmem [shape: f32[1,128], index: 6, kind: input, shape index: {}]   ;;  %s3415_s7 = inlined_call_operand.vmem [shape: bf16[128,128], index: 7, kind: input, shape index: {}]   ;;  %s3416_s8 = inlined_call_operand.vmem [shape: f32[1,128], index: 8, kind: input, shape index: {}]   ;;  %s3417_s9 = inlined_call_operand.vmem [shape: f32[1,128], index: 9, kind: input, shape index: {}]   ;;  %s3418_s10 = inlined_call_operand.<no memory space> [shape: f32[1,1], index: 10, kind: input, shape index: {}]   ;;  %s3419_s11 = inlined_call_operand.vmem [shape: bf16[128,128], index: 11, kind: input, shape index: {}]   ;;  %s3420_s12 = inlined_call_operand.vmem [shape: f32[1,128], index: 12, kind: input, shape index: {}]   ;;  %s3421_s13 = inlined_call_operand.vmem [shape: bf16[128,128], index: 13, kind: input, shape index: {}]   ;;  %s3422_s14 = inlined_call_operand.vmem [shape: f32[1,128], index: 14, kind: input, shape index: {}]   ;;  %s3423_s15 = inlined_call_operand.vmem [shape: f32[16,128], index: 15, kind: input, shape index: {}]   ;;  %s3424_s16 = inlined_call_operand.vmem [shape: f32[16,128], index: 16, kind: input, shape index: {}]   ;;  %s3425_s17 = inlined_call_operand.vmem [shape: f32[1,128], index: 17, kind: input, shape index: {}]   ;;  %s3426_s18 = inlined_call_operand.vmem [shape: f32[1,128], index: 18, kind: input, shape index: {}]   ;;  %s3427_s19 = inlined_call_operand.hbm [shape: f32[16,128], index: 19, kind: output, shape index: {}]  }
   0x1   :  { %3433 = sst [smem:[#allocation9_spill]] %s3408_s0  ;;  %v24_v0 = vstv %s3418_s10 }
   0x2   :  { %3434 = sst [smem:[#allocation10_spill]] %s3409_s1  ;;  %25 = vst [vmem:[#allocation2] sm:$0x1] %v24_v0 }
   0x3   :  { %3435 = sst [smem:[#allocation11_spill]] %s3410_s2 }
   0x4   :  { %3436 = sst [smem:[#allocation12_spill]] %s3411_s3 }
   0x5   :  { %3437 = sst [smem:[#allocation13_spill]] %s3424_s16 }
   0x6   :  { %3438 = sst [smem:[#allocation14_spill]] %s3425_s17 }
   0x7   :  { %3439 = sst [smem:[#allocation15_spill]] %s3426_s18 }
   0x8   :  { %3440 = sst [smem:[#allocation16_spill]] %s3427_s19 }
   0x9   :  { %26 = vsyncpa [#allocation4], 0  ;;  %s2723_s20 = smov 0   ;;  %s2725_s21 = smov 0  }
   0xa   :  { %s2727_s1 = smov 0  }
   0xb LB: > { %3441 = sst [smem:[#allocation6_spill]] %s2607_s21  ;;  %s41_s22 = sadd.s32 1, %s2607_s21  ;;  %s2611_s1 = sphi %s2727_s1, %s32_s1   ;;  %s2607_s21 = sphi %s2725_s21, %s3467_s21   ;;  %s2603_s20 = sphi %s2723_s20, %s3466_s20  }
   0xc   : > { %3442 = sst [smem:[#allocation7_spill]] %s2611_s1  ;;  %p42_p0 = scmp.ge.s32.totalorder %s41_s22, 3 }
   0xd   : > { %p2221_p1 = scmp.ge.s32.totalorder %s2611_s1, 1  ;;  %p605_p2 = scmp.lt.s32.totalorder %s2611_s1, 4 }
   0xe   : > { %s3469_s22 = smov (%p42_p0, %s41_s22), 0 }
   0xf   : > { %3443 = sst [smem:[#allocation8_spill]] %s3469_s22  ;;  %p606_p3 = pnand %p2221_p1, %p605_p2 }
  0x10   : > { %s2222_s2 = sshll.u32 (!%p606_p3), %s2603_s20, 4  ;;  %p691_p4 = scmp.lt.s32.totalorder (!%p606_p3), %s2603_s20, 2 }
  0x11   : > { %609 = sbr.rel (%p606_p3) target bundleno = 1598 (0x63e), region = 96  ;;  %p680_p5 = scmp.lt.s32.totalorder (!%p606_p3), %s2222_s2, 47 }
  0x12   : > { %s3444_s3 = sld [smem:[#allocation11_spill]] (!%p606_p3)  ;;  %p2228_p6 = scmp.ne.s32.totalorder (!%p606_p3), %s2603_s20, 0 }
  0x13   : > { %s3445_s0 = sld [smem:[#allocation9_spill]] (!%p606_p3) }
  0x14   : > { %s3446_s21 = sld [smem:[#allocation10_spill]] (!%p606_p3) }
  0x15   : > { %s3447_s17 = sld [smem:[#allocation12_spill]] (!%p606_p3) }
  0x16   : > { %s2747_s23 = scalar_select %p691_p4, %s2603_s20, 2 }
  0x17   : > { %s3471_s2 = smov (!%p680_p5, %s2222_s2), 47  ;;  %717 = sbr.rel (%p2228_p6) target bundleno = 31 (0x1f), region = 100 }
  0x18   : > { %s693_s26 = scalar_lea.vmem %s3444_s3, %s2747_s23  ;;  %s2223_s27 = sshll.u32 %s3471_s2, 3 }
  0x19   : > { %s2756_s30 = scalar_lea.vmem %s3445_s0, %s2223_s27 }
  0x1a   : > { %s2761_s19 = scalar_lea.vmem %s3446_s21, %s2223_s27 }
  0x1b   : > { %s2766_s16 = scalar_lea.vmem %s3447_s17, %s2223_s27 }
  0x1c   : > { %v2613_v1 = vmov 0.0  }
  0x1d   : > { %718 = vst [vmem:[#allocation3] sm:$0xff] %v2613_v1 }
  0x1e   : > { %719 = vst [vmem:[#allocation3 + $0x8] sm:$0xff] %v2613_v1 }
  0x1f PF: > { %v842_v2 = vld [vmem:[%s2761_s19] sm:$0xff]  ;;  %v724_v3 = vld [vmem:[%s2756_s30 + $0x10] sm:$0xff]  ;;  %v2614_v5 = vmov 0   ;;  %v843_v6 = vld [vmem:[%s2761_s19 + $0x8] sm:$0xff]  ;;  %v720_v37 = vlaneseq  ;;  %v2615_v44 = vmov 0.0   ;;  %vm972_vm4 = vcmask 130048  }
  0x20   : > { %v722_v4 = vld [vmem:[%s2756_s30] sm:$0xff]  ;;  %2479 = vset.pattern.permute.xlu2 %v2614_v5  ;;  %2478 = vset.pattern.permute.xlu1 %v2614_v5  ;;  %v725_v7 = vld [vmem:[%s2756_s30 + $0x18] sm:$0xff]  ;;  %v723_v8 = vld [vmem:[%s2756_s30 + $0x8] sm:$0xff]  ;;  %p2337_p7 = scmp.ne.s32.totalorder %s2603_s20, 2 }
  0x21   : > { %2477 = vset.pattern.permute.xlu0 %v2614_v5  ;;  %859 = vperm.xlu1 %2478, %v842_v2   ;;  %v845_v9 = vld [vmem:[%s2761_s19 + $0x18] sm:$0xff]  ;;  %v726_v10 = vld [vmem:[%s2756_s30 + $0x20] sm:$0xff]  ;;  %v844_v11 = vld [vmem:[%s2761_s19 + $0x10] sm:$0xff]  ;;  %v2808_v40 = vand.u32 127, %v720_v37  ;;  %s3459_s28 = sld [smem:[#allocation13_spill]] (!%p2337_p7) }
  0x22   : > { %745 = vperm.xlu2 %2479, %v724_v3   ;;  %739 = vperm.xlu0 %2477, %v722_v4   ;;  %v846_v12 = vld [vmem:[%s2761_s19 + $0x20] sm:$0xff]  ;;  %v847_v13 = vld [vmem:[%s2761_s19 + $0x28] sm:$0xff]  ;;  %v729_v15 = vld [vmem:[%s2756_s30 + $0x38] sm:$0xff]  ;;  %s3460_s18 = sld [smem:[#allocation14_spill]] (!%p2337_p7) }
  0x23   : > { %v727_v14 = vld [vmem:[%s2756_s30 + $0x28] sm:$0xff]  ;;  %v848_v16 = vld [vmem:[%s2761_s19 + $0x30] sm:$0xff]  ;;  %v730_v18 = vld [vmem:[%s2756_s30 + $0x40] sm:$0xff]  ;;  %s3461_s1 = sld [smem:[#allocation15_spill]] (!%p2337_p7) }
  0x24   : > { %v728_v17 = vld [vmem:[%s2756_s30 + $0x30] sm:$0xff]  ;;  %v731_v19 = vld [vmem:[%s2756_s30 + $0x48] sm:$0xff]  ;;  %v849_v20 = vld [vmem:[%s2761_s19 + $0x38] sm:$0xff] }
  0x25   : > { %v851_v21 = vld [vmem:[%s2761_s19 + $0x48] sm:$0xff]  ;;  %v732_v22 = vld [vmem:[%s2756_s30 + $0x50] sm:$0xff]  ;;  %v850_v23 = vld [vmem:[%s2761_s19 + $0x40] sm:$0xff] }
  0x26   : > { %v852_v24 = vld [vmem:[%s2761_s19 + $0x50] sm:$0xff]  ;;  %v853_v25 = vld [vmem:[%s2761_s19 + $0x58] sm:$0xff]  ;;  %v735_v27 = vld [vmem:[%s2756_s30 + $0x68] sm:$0xff] }
  0x27   : > { %v733_v26 = vld [vmem:[%s2756_s30 + $0x58] sm:$0xff]  ;;  %v854_v28 = vld [vmem:[%s2761_s19 + $0x60] sm:$0xff]  ;;  %v736_v30 = vld [vmem:[%s2756_s30 + $0x70] sm:$0xff] }
  0x28   : > { %v734_v29 = vld [vmem:[%s2756_s30 + $0x60] sm:$0xff]  ;;  %v737_v31 = vld [vmem:[%s2756_s30 + $0x78] sm:$0xff]  ;;  %v855_v32 = vld [vmem:[%s2761_s19 + $0x68] sm:$0xff] }
  0x29   : > { %862 = vperm.xlu1 %2478, %v843_v6   ;;  %v857_v33 = vld [vmem:[%s2761_s19 + $0x78] sm:$0xff]  ;;  %v856_v34 = vld [vmem:[%s2761_s19 + $0x70] sm:$0xff]  ;;  %v2407_v35 = vld [vmem:[%s3413_s5] sm:$0xff] }
  0x2a   : > { %748 = vperm.xlu2 %2479, %v725_v7   ;;  %742 = vperm.xlu0 %2477, %v723_v8   ;;  %v2406_v36 = vld [vmem:[%s3412_s4] sm:$0xff] }
  0x2b   : > { %1004 = vmatpush.bf16.msra.mxu0 %v2407_v35  ;;  %1083 = vmatpush.bf16.msra.mxu1 %v2406_v36 }
  0x31   : > { %868 = vperm.xlu1 %2478, %v845_v9  }
  0x32   : > { %751 = vperm.xlu2 %2479, %v726_v10   ;;  %865 = vperm.xlu0 %2477, %v844_v11  }
  0x39   : > { %871 = vperm.xlu1 %2478, %v846_v12  }
  0x3a   : > { %874 = vperm.xlu2 %2479, %v847_v13   ;;  %754 = vperm.xlu0 %2477, %v727_v14  }
  0x41   : > { %760 = vperm.xlu1 %2478, %v729_v15  }
  0x42   : > { %877 = vperm.xlu2 %2479, %v848_v16   ;;  %757 = vperm.xlu0 %2477, %v728_v17  }
  0x49   : > { %763 = vperm.xlu1 %2478, %v730_v18  }
  0x4a   : > { %766 = vperm.xlu2 %2479, %v731_v19   ;;  %880 = vperm.xlu0 %2477, %v849_v20  }
  0x51   : > { %886 = vperm.xlu1 %2478, %v851_v21  }
  0x52   : > { %769 = vperm.xlu2 %2479, %v732_v22   ;;  %883 = vperm.xlu0 %2477, %v850_v23  }
  0x59   : > { %889 = vperm.xlu1 %2478, %v852_v24  }
  0x5a   : > { %892 = vperm.xlu2 %2479, %v853_v25   ;;  %772 = vperm.xlu0 %2477, %v733_v26  }
  0x61   : > { %778 = vperm.xlu1 %2478, %v735_v27  }
  0x62   : > { %895 = vperm.xlu2 %2479, %v854_v28   ;;  %775 = vperm.xlu0 %2477, %v734_v29   ;;  %v2415_v28 = vld [vmem:[%s3415_s7 + $0x38] sm:$0xff] }
  0x63   : > { %1237 = vmatpush.bf16.msra.mxu2 %v2415_v28  ;;  %2432 = vmatpush.bf16.msra.mxu3 %v2415_v28 }
  0x69   : > { %781 = vperm.xlu1 %2478, %v736_v30  }
  0x6a   : > { %784 = vperm.xlu2 %2479, %v737_v31   ;;  %898 = vperm.xlu0 %2477, %v855_v32  }
  0x71   : > { %904 = vperm.xlu1 %2478, %v857_v33  }
  0x72   : > { %901 = vperm.xlu0 %2477, %v856_v34  }
  0x7c   : > { %v746_v41 = vpop.permute.xlu2 %745 }
  0x7d   : > { %vm788_vm7 = vcmp.eq.s32.totalorder %v2808_v40, %v746_v41  ;;  %v2414_v41 = vld [vmem:[%s3415_s7 + $0x30] sm:$0xff] }
  0x7e   : > { %v2231_v56 = vsel %vm788_vm7, 1.0, %v2615_v44  ;;  %1238 = vmatpush.bf16.msra.mxu2 %v2414_v41  ;;  %2433 = vmatpush.bf16.msra.mxu3 %v2414_v41 }
  0x84   : > { %v749_v51 = vpop.permute.xlu2 %748 }
  0x85   : > { %vm789_vm8 = vcmp.eq.s32.totalorder %v2808_v40, %v749_v51 }
  0x86   : > { %v2232_v57 = vsel %vm789_vm8, 1.0, %v2615_v44 }
  0x87   : > { %v835_v59 = vpack.c.bf16 %v2232_v57, %v2231_v56 }
  0x8c   : > { %v752_v60 = vpop.permute.xlu2 %751 }
  0x8d   : > { %vm790_vm12 = vcmp.eq.s32.totalorder %v2808_v40, %v752_v60  ;;  %v2408_v60 = vld [vmem:[%s3415_s7] sm:$0xff] }
  0x8e   : > { %v2233_v4 = vsel %vm790_vm12, 1.0, %v2615_v44 }
  0x93   : > { %v860_v38 = vpop.permute.xlu1 %859 }
  0x94   : > { %v740_v39 = vpop.permute.xlu0 %739  ;;  %vm906_vm0 = vcmp.eq.s32.totalorder %v2808_v40, %v860_v38  ;;  %v875_v63 = vpop.permute.xlu2 %874 }
  0x95   : > { %vm786_vm1 = vcmp.eq.s32.totalorder %v2808_v40, %v740_v39  ;;  %v2245_v45 = vsel %vm906_vm0, 1.0, %v2615_v44  ;;  %vm911_vm11 = vcmp.eq.s32.totalorder %v2808_v40, %v875_v63 }
  0x96   : > { %v2229_v47 = vsel %vm786_vm1, 1.0, %v2615_v44  ;;  %v2250_v3 = vsel %vm911_vm11, 1.0, %v2615_v44 }
  0x9b   : > { %v863_v42 = vpop.permute.xlu1 %862 }
  0x9c   : > { %vm907_vm2 = vcmp.eq.s32.totalorder %v2808_v40, %v863_v42  ;;  %v743_v43 = vpop.permute.xlu0 %742  ;;  %v878_v9 = vpop.permute.xlu2 %877  ;;  %v2413_v42 = vld [vmem:[%s3415_s7 + $0x28] sm:$0xff] }
  0x9d   : > { %v2246_v46 = vsel %vm907_vm2, 1.0, %v2615_v44  ;;  %vm787_vm3 = vcmp.eq.s32.totalorder %v2808_v40, %v743_v43  ;;  %vm912_vm0 = vcmp.eq.s32.totalorder %v2808_v40, %v878_v9  ;;  %1239 = vmatpush.bf16.msra.mxu2 %v2413_v42  ;;  %2434 = vmatpush.bf16.msra.mxu3 %v2413_v42 }
  0x9e   : > { %v954_v48 = vpack.c.bf16 %v2246_v46, %v2245_v45  ;;  %v2230_v49 = vsel %vm787_vm3, 1.0, %v2615_v44  ;;  %v2251_v14 = vsel %vm912_vm0, 1.0, %v2615_v44  ;;  %v2412_v46 = vld [vmem:[%s3415_s7 + $0x20] sm:$0xff] }
  0x9f   : > { %v834_v50 = vpack.c.bf16 %v2230_v49, %v2229_v47 }
  0xa0   : > { %2265 = vmatmul.msk.bf16.vlgmr.msra.gmra.mxu0 %vm972_vm4, %v954_v48 }
  0xa1   : > { %2277 = vmatmul.msk.bf16.vlgmr.msra.gmra.mxu1 %vm972_vm4, %v834_v50  ;;  %1240 = vmatpush.bf16.msra.mxu2 %v2412_v46 }
  0xa2   : > { %2435 = vmatpush.bf16.msra.mxu3 %v2412_v46 }
  0xa3   : > { %v869_v52 = vpop.permute.xlu1 %868 }
  0xa4   : > { %v866_v53 = vpop.permute.xlu0 %865  ;;  %vm909_vm5 = vcmp.eq.s32.totalorder %v2808_v40, %v869_v52  ;;  %v767_v17 = vpop.permute.xlu2 %766 }
  0xa5   : > { %vm908_vm6 = vcmp.eq.s32.totalorder %v2808_v40, %v866_v53  ;;  %v2248_v54 = vsel %vm909_vm5, 1.0, %v2615_v44  ;;  %vm795_vm5 = vcmp.eq.s32.totalorder %v2808_v40, %v767_v17  ;;  %v2411_v53 = vld [vmem:[%s3415_s7 + $0x18] sm:$0xff] }
  0xa6   : > { %v2247_v55 = vsel %vm908_vm6, 1.0, %v2615_v44  ;;  %v2238_v24 = vsel %vm795_vm5, 1.0, %v2615_v44  ;;  %1241 = vmatpush.bf16.msra.mxu2 %v2411_v53  ;;  %2436 = vmatpush.bf16.msra.mxu3 %v2411_v53 }
  0xa7   : > { %v955_v58 = vpack.c.bf16 %v2248_v54, %v2247_v55  ;;  %v2410_v55 = vld [vmem:[%s3415_s7 + $0x10] sm:$0xff] }
  0xaa   : > { %1242 = vmatpush.bf16.msra.mxu2 %v2410_v55  ;;  %2437 = vmatpush.bf16.msra.mxu3 %v2410_v55 }
  0xab   : > { %v872_v62 = vpop.permute.xlu1 %871 }
  0xac   : > { %v755_v61 = vpop.permute.xlu0 %754  ;;  %vm910_vm9 = vcmp.eq.s32.totalorder %v2808_v40, %v872_v62  ;;  %v770_v23 = vpop.permute.xlu2 %769 }
  0xad   : > { %vm791_vm10 = vcmp.eq.s32.totalorder %v2808_v40, %v755_v61  ;;  %v2249_v0 = vsel %vm910_vm9, 1.0, %v2615_v44  ;;  %vm796_vm9 = vcmp.eq.s32.totalorder %v2808_v40, %v770_v23 }
  0xae   : > { %v2234_v2 = vsel %vm791_vm10, 1.0, %v2615_v44  ;;  %v956_v5 = vpack.c.bf16 %v2250_v3, %v2249_v0  ;;  %v2239_v35 = vsel %vm796_vm9, 1.0, %v2615_v44 }
  0xaf   : > { %v836_v6 = vpack.c.bf16 %v2234_v2, %v2233_v4 }
  0xb0   : > { %2266 = vmatmul.msk.bf16.gmra.mxu0 %vm972_vm4, %v955_v58  ;;  %v2409_v58 = vld [vmem:[%s3415_s7 + $0x8] sm:$0xff] }
  0xb1   : > { %2278 = vmatmul.msk.bf16.gmra.mxu1 %vm972_vm4, %v835_v59  ;;  %1243 = vmatpush.bf16.msra.mxu2 %v2409_v58 }
  0xb2   : > { %2438 = vmatpush.bf16.msra.mxu3 %v2409_v58 }
  0xb3   : > { %v761_v7 = vpop.permute.xlu1 %760 }
  0xb4   : > { %v758_v1 = vpop.permute.xlu0 %757  ;;  %vm793_vm14 = vcmp.eq.s32.totalorder %v2808_v40, %v761_v7  ;;  %v893_v30 = vpop.permute.xlu2 %892 }
  0xb5   : > { %vm792_vm15 = vcmp.eq.s32.totalorder %v2808_v40, %v758_v1  ;;  %v2236_v12 = vsel %vm793_vm14, 1.0, %v2615_v44  ;;  %vm917_vm8 = vcmp.eq.s32.totalorder %v2808_v40, %v893_v30  ;;  %1244 = vmatpush.bf16.msra.mxu2 %v2408_v60 }
  0xb6   : > { %v2235_v13 = vsel %vm792_vm15, 1.0, %v2615_v44  ;;  %v2256_v34 = vsel %vm917_vm8, 1.0, %v2615_v44  ;;  %2439 = vmatpush.bf16.msra.mxu3 %v2408_v60 }
  0xb7   : > { %v837_v16 = vpack.c.bf16 %v2236_v12, %v2235_v13 }
  0xbb   : > { %v764_v10 = vpop.permute.xlu1 %763 }
  0xbc   : > { %v881_v8 = vpop.permute.xlu0 %880  ;;  %vm794_vm3 = vcmp.eq.s32.totalorder %v2808_v40, %v764_v10  ;;  %v896_v45 = vpop.permute.xlu2 %895 }
  0xbd   : > { %vm913_vm13 = vcmp.eq.s32.totalorder %v2808_v40, %v881_v8  ;;  %v2237_v22 = vsel %vm794_vm3, 1.0, %v2615_v44 }
  0xbe   : > { %v2252_v11 = vsel %vm913_vm13, 1.0, %v2615_v44  ;;  %v838_v26 = vpack.c.bf16 %v2238_v24, %v2237_v22  ;;  %vm918_vm13 = vcmp.eq.s32.totalorder %v2808_v40, %v896_v45 }
  0xbf   : > { %v957_v15 = vpack.c.bf16 %v2252_v11, %v2251_v14  ;;  %v2257_v51 = vsel %vm918_vm13, 1.0, %v2615_v44 }
  0xc0   : > { %2267 = vmatmul.msk.bf16.gmra.mxu0 %vm972_vm4, %v956_v5 }
  0xc1   : > { %2279 = vmatmul.msk.bf16.gmra.mxu1 %vm972_vm4, %v836_v6  ;;  %v2917_v6 = vld [vmem:[%s3414_s6] ss:$0 sm:$0xff] }
  0xc3   : > { %v887_v18 = vpop.permute.xlu1 %886 }
  0xc4   : > { %v884_v19 = vpop.permute.xlu0 %883  ;;  %vm915_vm1 = vcmp.eq.s32.totalorder %v2808_v40, %v887_v18  ;;  %v785_v59 = vpop.permute.xlu2 %784 }
  0xc5   : > { %vm914_vm2 = vcmp.eq.s32.totalorder %v2808_v40, %v884_v19  ;;  %v2254_v20 = vsel %vm915_vm1, 1.0, %v2615_v44  ;;  %vm801_vm1 = vcmp.eq.s32.totalorder %v2808_v40, %v785_v59 }
  0xc6   : > { %v2253_v21 = vsel %vm914_vm2, 1.0, %v2615_v44  ;;  %v2244_v0 = vsel %vm801_vm1, 1.0, %v2615_v44 }
  0xc7   : > { %v958_v25 = vpack.c.bf16 %v2254_v20, %v2253_v21 }
  0xcb   : > { %v890_v29 = vpop.permute.xlu1 %889 }
  0xcc   : > { %v773_v27 = vpop.permute.xlu0 %772  ;;  %vm916_vm6 = vcmp.eq.s32.totalorder %v2808_v40, %v890_v29 }
  0xcd   : > { %vm797_vm7 = vcmp.eq.s32.totalorder %v2808_v40, %v773_v27  ;;  %v2255_v31 = vsel %vm916_vm6, 1.0, %v2615_v44 }
  0xce   : > { %v2240_v33 = vsel %vm797_vm7, 1.0, %v2615_v44  ;;  %v959_v36 = vpack.c.bf16 %v2256_v34, %v2255_v31 }
  0xcf   : > { %v839_v38 = vpack.c.bf16 %v2240_v33, %v2239_v35 }
  0xd0   : > { %2268 = vmatmul.msk.bf16.gmra.mxu0 %vm972_vm4, %v957_v15 }
  0xd1   : > { %2280 = vmatmul.msk.bf16.gmra.mxu1 %vm972_vm4, %v837_v16 }
  0xd3   : > { %v779_v39 = vpop.permute.xlu1 %778 }
  0xd4   : > { %v776_v32 = vpop.permute.xlu0 %775  ;;  %vm799_vm11 = vcmp.eq.s32.totalorder %v2808_v40, %v779_v39 }
  0xd5   : > { %vm798_vm12 = vcmp.eq.s32.totalorder %v2808_v40, %v776_v32  ;;  %v2242_v49 = vsel %vm799_vm11, 1.0, %v2615_v44 }
  0xd6   : > { %v2241_v50 = vsel %vm798_vm12, 1.0, %v2615_v44 }
  0xd7   : > { %v840_v54 = vpack.c.bf16 %v2242_v49, %v2241_v50 }
  0xdb   : > { %v782_v47 = vpop.permute.xlu1 %781 }
  0xdc   : > { %v899_v43 = vpop.permute.xlu0 %898  ;;  %vm800_vm0 = vcmp.eq.s32.totalorder %v2808_v40, %v782_v47 }
  0xdd   : > { %vm919_vm10 = vcmp.eq.s32.totalorder %v2808_v40, %v899_v43  ;;  %v2243_v63 = vsel %vm800_vm0, 1.0, %v2615_v44 }
  0xde   : > { %v2258_v48 = vsel %vm919_vm10, 1.0, %v2615_v44  ;;  %v841_v2 = vpack.c.bf16 %v2244_v0, %v2243_v63 }
  0xdf   : > { %v960_v52 = vpack.c.bf16 %v2258_v48, %v2257_v51 }
  0xe0   : > { %2269 = vmatmul.msk.bf16.gmra.mxu0 %vm972_vm4, %v958_v25 }
  0xe1   : > { %2281 = vmatmul.msk.bf16.gmra.mxu1 %vm972_vm4, %v838_v26 }
  0xe3   : > { %v905_v56 = vpop.permute.xlu1 %904 }
  0xe4   : > { %v902_v57 = vpop.permute.xlu0 %901  ;;  %vm921_vm14 = vcmp.eq.s32.totalorder %v2808_v40, %v905_v56 }
  0xe5   : > { %vm920_vm15 = vcmp.eq.s32.totalorder %v2808_v40, %v902_v57  ;;  %v2260_v61 = vsel %vm921_vm14, 1.0, %v2615_v44 }
  0xe6   : > { %v2259_v62 = vsel %vm920_vm15, 1.0, %v2615_v44 }
  0xe7   : > { %v961_v1 = vpack.c.bf16 %v2260_v61, %v2259_v62 }
  0xf0   : > { %2270 = vmatmul.msk.bf16.gmra.mxu0 %vm972_vm4, %v959_v36 }
  0xf1   : > { %2282 = vmatmul.msk.bf16.gmra.mxu1 %vm972_vm4, %v839_v38 }
 0x100   : > { %2271 = vmatmul.msk.bf16.gmra.mxu0 %vm972_vm4, %v960_v52 }
 0x101   : > { %2283 = vmatmul.msk.bf16.gmra.mxu1 %vm972_vm4, %v840_v54 }
 0x110   : > { %2272 = vmatmul.msk.bf16.gmra.mxu0 %vm972_vm4, %v961_v1 }
 0x111   : > { %2284 = vmatmul.msk.bf16.gmra.mxu1 %vm972_vm4, %v841_v2 }
 0x11d   : > { %v1006_v3 = vpop.f32.mrf.mxu0 }
 0x11e   : > { %v1085_v4 = vpop.f32.mrf.mxu1 }
 0x11f   : > { %v1086_v5 = vadd.f32 %v1085_v4, %v1006_v3 }
 0x121   : > { %v1129_v9 = vadd.f32 %v2917_v6, %v1086_v5 }
 0x123   : > { %v1145_v11 = vmax.f32 %v1129_v9, 0.0 }
 0x125   : > { %v1008_v7 = vpop.f32.mrf.mxu0 }
 0x126   : > { %v1087_v8 = vpop.f32.mrf.mxu1 }
 0x127   : > { %v1088_v10 = vadd.f32 %v1087_v8, %v1008_v7 }
 0x129   : > { %v1130_v44 = vadd.f32 %v2917_v6, %v1088_v10 }
 0x12b   : > { %v1146_v12 = vmax.f32 %v1130_v44, 0.0 }
 0x12d   : > { %v1011_v13 = vpop.f32.mrf.mxu0  ;;  %v1161_v14 = vpack.c.bf16 %v1146_v12, %v1145_v11 }
 0x12e   : > { %v1090_v15 = vpop.f32.mrf.mxu1 }
 0x12f   : > { %1245 = vmatmul.bf16.vlgmr.msra.gmra.mxu2 %v1161_v14  ;;  %v1091_v16 = vadd.f32 %v1090_v15, %v1011_v13 }
 0x131   : > { %v1131_v19 = vadd.f32 %v2917_v6, %v1091_v16 }
 0x133   : > { %v1147_v22 = vmax.f32 %v1131_v19, 0.0 }
 0x135   : > { %v1013_v17 = vpop.f32.mrf.mxu0 }
 0x136   : > { %v1092_v18 = vpop.f32.mrf.mxu1 }
 0x137   : > { %v1093_v20 = vadd.f32 %v1092_v18, %v1013_v17 }
 0x139   : > { %v1132_v21 = vadd.f32 %v2917_v6, %v1093_v20 }
 0x13b   : > { %v1148_v23 = vmax.f32 %v1132_v21, 0.0 }
 0x13d   : > { %v1016_v24 = vpop.f32.mrf.mxu0  ;;  %v1162_v25 = vpack.c.bf16 %v1148_v23, %v1147_v22 }
 0x13e   : > { %v1095_v26 = vpop.f32.mrf.mxu1 }
 0x13f   : > { %1250 = vmatmul.bf16.gmra.mxu2 %v1162_v25  ;;  %v1096_v27 = vadd.f32 %v1095_v26, %v1016_v24 }
 0x141   : > { %v1133_v30 = vadd.f32 %v2917_v6, %v1096_v27 }
 0x143   : > { %v1149_v33 = vmax.f32 %v1133_v30, 0.0 }
 0x145   : > { %v1018_v28 = vpop.f32.mrf.mxu0 }
 0x146   : > { %v1097_v29 = vpop.f32.mrf.mxu1 }
 0x147   : > { %v1098_v31 = vadd.f32 %v1097_v29, %v1018_v28 }
 0x149   : > { %v1134_v32 = vadd.f32 %v2917_v6, %v1098_v31 }
 0x14b   : > { %v1150_v34 = vmax.f32 %v1134_v32, 0.0 }
 0x14d   : > { %v1021_v35 = vpop.f32.mrf.mxu0  ;;  %v1163_v36 = vpack.c.bf16 %v1150_v34, %v1149_v33 }
 0x14e   : > { %v1100_v38 = vpop.f32.mrf.mxu1 }
 0x14f   : > { %1255 = vmatmul.bf16.gmra.mxu2 %v1163_v36  ;;  %v1101_v39 = vadd.f32 %v1100_v38, %v1021_v35 }
 0x151   : > { %v1135_v43 = vadd.f32 %v2917_v6, %v1101_v39  ;;  %v2942_v39 = vld [vmem:[%s3416_s8] ss:$0 sm:$0xff] }
 0x153   : > { %v1151_v47 = vmax.f32 %v1135_v43, 0.0  ;;  %v2951_v43 = vld [vmem:[%s3417_s9] ss:$0 sm:$0xff] }
 0x155   : > { %v1023_v41 = vpop.f32.mrf.mxu0 }
 0x156   : > { %v1102_v42 = vpop.f32.mrf.mxu1 }
 0x157   : > { %v1103_v45 = vadd.f32 %v1102_v42, %v1023_v41 }
 0x159   : > { %v1136_v46 = vadd.f32 %v2917_v6, %v1103_v45 }
 0x15b   : > { %v1152_v48 = vmax.f32 %v1136_v46, 0.0 }
 0x15d   : > { %v1026_v49 = vpop.f32.mrf.mxu0  ;;  %v1164_v50 = vpack.c.bf16 %v1152_v48, %v1151_v47 }
 0x15e   : > { %v1105_v51 = vpop.f32.mrf.mxu1 }
 0x15f   : > { %1260 = vmatmul.bf16.gmra.mxu2 %v1164_v50  ;;  %v1106_v52 = vadd.f32 %v1105_v51, %v1026_v49 }
 0x161   : > { %v1137_v55 = vadd.f32 %v2917_v6, %v1106_v52 }
 0x163   : > { %v1153_v58 = vmax.f32 %v1137_v55, 0.0 }
 0x165   : > { %v1028_v53 = vpop.f32.mrf.mxu0 }
 0x166   : > { %v1107_v54 = vpop.f32.mrf.mxu1 }
 0x167   : > { %v1108_v56 = vadd.f32 %v1107_v54, %v1028_v53 }
 0x169   : > { %v1138_v57 = vadd.f32 %v2917_v6, %v1108_v56 }
 0x16b   : > { %v1154_v59 = vmax.f32 %v1138_v57, 0.0 }
 0x16d   : > { %v1031_v60 = vpop.f32.mrf.mxu0  ;;  %v1165_v61 = vpack.c.bf16 %v1154_v59, %v1153_v58 }
 0x16e   : > { %v1110_v62 = vpop.f32.mrf.mxu1 }
 0x16f   : > { %1265 = vmatmul.bf16.gmra.mxu2 %v1165_v61  ;;  %v1111_v63 = vadd.f32 %v1110_v62, %v1031_v60 }
 0x171   : > { %v1139_v2 = vadd.f32 %v2917_v6, %v1111_v63 }
 0x173   : > { %v1155_v5 = vmax.f32 %v1139_v2, 0.0 }
 0x175   : > { %v1033_v0 = vpop.f32.mrf.mxu0 }
 0x176   : > { %v1112_v1 = vpop.f32.mrf.mxu1 }
 0x177   : > { %v1113_v3 = vadd.f32 %v1112_v1, %v1033_v0 }
 0x179   : > { %v1140_v4 = vadd.f32 %v2917_v6, %v1113_v3 }
 0x17b   : > { %v1156_v7 = vmax.f32 %v1140_v4, 0.0 }
 0x17d   : > { %v1036_v8 = vpop.f32.mrf.mxu0  ;;  %v1166_v9 = vpack.c.bf16 %v1156_v7, %v1155_v5 }
 0x17e   : > { %v1115_v10 = vpop.f32.mrf.mxu1 }
 0x17f   : > { %1270 = vmatmul.bf16.gmra.mxu2 %v1166_v9  ;;  %v1116_v44 = vadd.f32 %v1115_v10, %v1036_v8 }
 0x181   : > { %v1141_v13 = vadd.f32 %v2917_v6, %v1116_v44 }
 0x183   : > { %v1157_v16 = vmax.f32 %v1141_v13, 0.0 }
 0x185   : > { %v1038_v11 = vpop.f32.mrf.mxu0 }
 0x186   : > { %v1117_v12 = vpop.f32.mrf.mxu1 }
 0x187   : > { %v1118_v14 = vadd.f32 %v1117_v12, %v1038_v11 }
 0x189   : > { %v1142_v15 = vadd.f32 %v2917_v6, %v1118_v14 }
 0x18b   : > { %v1158_v17 = vmax.f32 %v1142_v15, 0.0 }
 0x18d   : > { %v1041_v18 = vpop.f32.mrf.mxu0  ;;  %v1167_v19 = vpack.c.bf16 %v1158_v17, %v1157_v16 }
 0x18e   : > { %v1120_v20 = vpop.f32.mrf.mxu1 }
 0x18f   : > { %1275 = vmatmul.bf16.vlgmr.msra.gmra.mxu3 %v1167_v19  ;;  %v1121_v21 = vadd.f32 %v1120_v20, %v1041_v18 }
 0x191   : > { %v1143_v24 = vadd.f32 %v2917_v6, %v1121_v21 }
 0x193   : > { %v1159_v27 = vmax.f32 %v1143_v24, 0.0 }
 0x195   : > { %v1043_v22 = vpop.f32.mrf.mxu0 }
 0x196   : > { %v1122_v23 = vpop.f32.mrf.mxu1 }
 0x197   : > { %v1123_v25 = vadd.f32 %v1122_v23, %v1043_v22 }
 0x199   : > { %v1144_v26 = vadd.f32 %v2917_v6, %v1123_v25 }
 0x19b   : > { %v1160_v28 = vmax.f32 %v1144_v26, 0.0 }
 0x19d   : > { %v1168_v29 = vpack.c.bf16 %v1160_v28, %v1159_v27 }
 0x19f   : > { %1280 = vmatmul.bf16.gmra.mxu3 %v1168_v29 }
 0x1b2   : > { %v2935_v30 = vpop.f32.mrf.mxu2 }
 0x1b3   : > { %v3051_v29 = vadd.f32 %v2942_v39, %v2935_v30  ;;  %v3063_v30 = vld [vmem:[#allocation2] ss:$0 sm:$0xff] }
 0x1ba   : > { %v1248_v31 = vpop.f32.mrf.mxu2 }
 0x1bb   : > { %v3009_v44 = vadd.f32 %v2942_v39, %v1248_v31 }
 0x1bd   : > { %v3431_v14 = vmax.f32 %v3009_v44, 0.0 }
 0x1bf   : > { %v1307_v20 = vmul.f32 %v2951_v43, %v3431_v14 }
 0x1c2   : > { %v1251_v32 = vpop.f32.mrf.mxu2 }
 0x1c3   : > { %v2986_v0 = vadd.f32 %v2942_v39, %v1251_v32 }
 0x1c5   : > { %v1288_v4 = vmax.f32 %v2986_v0, 0.0 }
 0x1c7   : > { %v1308_v10 = vmul.f32 %v2951_v43, %v1288_v4 }
 0x1ca   : > { %v2937_v33 = vpop.f32.mrf.mxu2 }
 0x1cb   : > { %v3036_v23 = vadd.f32 %v2942_v39, %v2937_v33  ;;  %v3432_v33 = vmax.f32 %v3051_v29, 0.0 }
 0x1cd   : > { %v1289_v27 = vmax.f32 %v3036_v23, 0.0 }
 0x1cf   : > { %v1309_v32 = vmul.f32 %v2951_v43, %v1289_v27 }
 0x1d2   : > { %v1256_v34 = vpop.f32.mrf.mxu2 }
 0x1d3   : > { %v3018_v16 = vadd.f32 %v2942_v39, %v1256_v34  ;;  %v1306_v34 = vmul.f32 %v2951_v43, %v3432_v33 }
 0x1d5   : > { %v1290_v21 = vmax.f32 %v3018_v16, 0.0  ;;  %v2484_v16 = vld [vmem:[%s693_s26] ss:$0 sm:$0xff] }
 0x1d7   : > { %v1310_v26 = vmul.f32 %v2951_v43, %v1290_v21 }
 0x1da   : > { %v1258_v35 = vpop.f32.mrf.mxu2 }
 0x1db   : > { %v3039_v24 = vadd.f32 %v2942_v39, %v1258_v35  ;;  %v1384_v35 = vld [vmem:[%s2766_s16 + $0x50] sm:$0xff] }
 0x1dd   : > { %v1291_v28 = vmax.f32 %v3039_v24, 0.0 }
 0x1df   : > { %v1311_v31 = vmul.f32 %v2951_v43, %v1291_v28 }
 0x1e2   : > { %v1261_v36 = vpop.f32.mrf.mxu2 }
 0x1e3   : > { %v3021_v17 = vadd.f32 %v2942_v39, %v1261_v36 }
 0x1e5   : > { %v1292_v22 = vmax.f32 %v3021_v17, 0.0 }
 0x1e7   : > { %v1312_v25 = vmul.f32 %v2951_v43, %v1292_v22 }
 0x1ea   : > { %v1263_v38 = vpop.f32.mrf.mxu2 }
 0x1eb   : > { %v2975_v58 = vadd.f32 %v2942_v39, %v1263_v38 }
 0x1ed   : > { %v1293_v61 = vmax.f32 %v2975_v58, 0.0 }
 0x1ef   : > { %v1313_v2 = vmul.f32 %v2951_v43, %v1293_v61 }
 0x1f2   : > { %v1266_v6 = vpop.f32.mrf.mxu2 }
 0x1f3   : > { %v2945_v41 = vadd.f32 %v2942_v39, %v1266_v6 }
 0x1f5   : > { %v1294_v42 = vmax.f32 %v2945_v41, 0.0 }
 0x1f7   : > { %v1314_v45 = vmul.f32 %v2951_v43, %v1294_v42 }
 0x1f9   : > { %1338 = vadd.xlane.f32.xlu1 %v1314_v45 }
 0x1fa   : > { %v1268_v46 = vpop.f32.mrf.mxu2 }
 0x1fb   : > { %v3000_v8 = vadd.f32 %v2942_v39, %v1268_v46 }
 0x1fd   : > { %v1295_v12 = vmax.f32 %v3000_v8, 0.0 }
 0x1ff   : > { %v1315_v19 = vmul.f32 %v2951_v43, %v1295_v12 }
 0x202   : > { %v1271_v47 = vpop.f32.mrf.mxu2 }
 0x203   : > { %v2957_v48 = vadd.f32 %v2942_v39, %v1271_v47  ;;  %v1382_v47 = vld [vmem:[%s2766_s16 + $0x40] sm:$0xff] }
 0x205   : > { %v1296_v49 = vmax.f32 %v2957_v48, 0.0 }
 0x207   : > { %v1316_v50 = vmul.f32 %v2951_v43, %v1296_v49 }
 0x209   : > { %1342 = vadd.xlane.f32.xlu2 %v1316_v50  ;;  %v1385_v50 = vld [vmem:[%s2766_s16 + $0x58] sm:$0xff] }
 0x20a   : > { %v1273_v51 = vpop.f32.mrf.mxu2 }
 0x20b   : > { %v2964_v52 = vadd.f32 %v2942_v39, %v1273_v51 }
 0x20d   : > { %v1297_v53 = vmax.f32 %v2964_v52, 0.0 }
 0x20f   : > { %v1317_v54 = vmul.f32 %v2951_v43, %v1297_v53 }
 0x211   : > { %1344 = vadd.xlane.f32.xlu0 %v1317_v54 }
 0x212   : > { %v1276_v55 = vpop.f32.mrf.mxu3 }
 0x213   : > { %v2971_v56 = vadd.f32 %v2942_v39, %v1276_v55 }
 0x215   : > { %v1298_v57 = vmax.f32 %v2971_v56, 0.0 }
 0x217   : > { %v1318_v59 = vmul.f32 %v2951_v43, %v1298_v57 }
 0x219   : > { %1346 = vadd.xlane.f32.xlu1 %v1318_v59 }
 0x21a   : > { %v1278_v60 = vpop.f32.mrf.mxu3 }
 0x21b   : > { %v2982_v62 = vadd.f32 %v2942_v39, %v1278_v60 }
 0x21d   : > { %v1299_v63 = vmax.f32 %v2982_v62, 0.0 }
 0x21f   : > { %v1319_v1 = vmul.f32 %v2951_v43, %v1299_v63 }
 0x221   : > { %1348 = vadd.xlane.f32.xlu2 %v1319_v1  ;;  %1336 = vadd.xlane.f32.xlu1 %v1313_v2 }
 0x222   : > { %v1281_v3 = vpop.f32.mrf.mxu3 }
 0x223   : > { %v2996_v5 = vadd.f32 %v2942_v39, %v1281_v3  ;;  %v1386_v3 = vld [vmem:[%s2766_s16 + $0x60] sm:$0xff] }
 0x225   : > { %v1300_v7 = vmax.f32 %v2996_v5, 0.0 }
 0x227   : > { %v1320_v9 = vmul.f32 %v2951_v43, %v1300_v7 }
 0x229   : > { %1350 = vadd.xlane.f32.xlu2 %v1320_v9  ;;  %1326 = vadd.xlane.f32.xlu1 %v1308_v10 }
 0x22a   : > { %v1283_v11 = vpop.f32.mrf.mxu3 }
 0x22b   : > { %v3013_v13 = vadd.f32 %v2942_v39, %v1283_v11 }
 0x22d   : > { %v1301_v15 = vmax.f32 %v3013_v13, 0.0 }
 0x22f   : > { %v1321_v18 = vmul.f32 %v2951_v43, %v1301_v15 }
 0x231   : > { %1352 = vadd.xlane.f32.xlu0 %v1321_v18  ;;  %1340 = vadd.xlane.f32.xlu2 %v1315_v19 }
 0x232   : > { %1324 = vadd.xlane.f32.xlu1 %v1307_v20 }
 0x239   : > { %1334 = vadd.xlane.f32.xlu0 %v1312_v25  ;;  %1330 = vadd.xlane.f32.xlu2 %v1310_v26 }
 0x241   : > { %1332 = vadd.xlane.f32.xlu0 %v1311_v31  ;;  %1328 = vadd.xlane.f32.xlu2 %v1309_v32  ;;  %v1387_v32 = vld [vmem:[%s2766_s16 + $0x68] sm:$0xff] }
 0x249   : > { %1322 = vadd.xlane.f32.xlu0 %v1306_v34 }
 0x26c   : > { %v1339_v39 = vpop.xlane.xlu1 %1338 }
 0x26d   : > { %v1366_v45 = vadd.f32 %v3063_v30, %v1339_v39 }
 0x26f   : > { %v1398_v54 = vmul.f32 %v1382_v47, %v1366_v45 }
 0x271   : > { %v2325_v60 = vmul.f32 -1.442695, %v1398_v54 }
 0x27c   : > { %v1343_v36 = vpop.xlane.xlu2 %1342 }
 0x27d   : > { %v1368_v38 = vadd.f32 %v3063_v30, %v1343_v36 }
 0x27f   : > { %v1400_v6 = vmul.f32 %v1384_v35, %v1368_v38  ;;  %v1381_v35 = vld [vmem:[%s2766_s16 + $0x38] sm:$0xff] }
 0x281   : > { %v2327_v46 = vmul.f32 -1.442695, %v1400_v6 }
 0x283   : > { %2485 = vpow2.f32 %v2327_v46 }
 0x284   : > { %v1345_v51 = vpop.xlane.xlu0 %1344 }
 0x285   : > { %v1369_v43 = vadd.f32 %v3063_v30, %v1345_v51 }
 0x287   : > { %v1401_v55 = vmul.f32 %v1385_v50, %v1369_v43 }
 0x289   : > { %v2486_v59 = vpop.eup %2485  ;;  %v2328_v1 = vmul.f32 -1.442695, %v1401_v55 }
 0x28a   : > { %v1464_v2 = vadd.f32 1.0, %v2486_v59 }
 0x28b   : > { %2487 = vpow2.f32 %v2328_v1 }
 0x28c   : > { %2489 = vrcp.f32 %v1464_v2  ;;  %v1347_v9 = vpop.xlane.xlu1 %1346  ;;  %v1629_v46 = vand.u32 2147483647, %v1464_v2  ;;  %v1631_v47 = vand.u32 2147483648, %v1464_v2  ;;  %vm1625_vm2 = vweird.f32 %v1464_v2 }
 0x28d   : > { %2491 = vpow2.f32 %v2325_v60  ;;  %v1370_v10 = vadd.f32 %v3063_v30, %v1347_v9 }
 0x28e   : > { %v1632_v9 = vor.u32 1.1754944e-38, %v1631_v47  ;;  %vm1630_vm5 = vcmp.eq.f32.partialorder %v1629_v46, 8.507059e+37 }
 0x28f   : > { %v1402_v11 = vmul.f32 %v1386_v3, %v1370_v10 }
 0x291   : > { %v2488_v18 = vpop.eup %2487  ;;  %v2329_v19 = vmul.f32 -1.442695, %v1402_v11 }
 0x292   : > { %v2490_v20 = vpop.eup %2489  ;;  %v3073_v25 = vadd.f32 1.0, %v2488_v18  ;;  %v1388_v18 = vld [vmem:[%s2766_s16 + $0x70] sm:$0xff] }
 0x293   : > { %v2492_v26 = vpop.eup %2491  ;;  %2493 = vpow2.f32 %v2329_v19  ;;  %v1621_v31 = vmul.f32 %v2490_v20, %v1464_v2  ;;  %vm1626_vm4 = vweird.f32 %v2490_v20 }
 0x294   : > { %2495 = vrcp.f32 %v3073_v25  ;;  %v1349_v34 = vpop.xlane.xlu2 %1348  ;;  %v1337_v36 = vpop.xlane.xlu1 %1336  ;;  %v3080_v45 = vadd.f32 1.0, %v2492_v26  ;;  %vm1627_vm3 = vmor %vm1625_vm2, %vm1626_vm4  ;;  %vm1640_vm7 = vweird.f32 %v3073_v25 }
 0x295   : > { %v1371_v38 = vadd.f32 %v3063_v30, %v1349_v34  ;;  %v1365_v39 = vadd.f32 %v3063_v30, %v1337_v36  ;;  %v1622_v6 = vsub.f32 1.0, %v1621_v31  ;;  %v1646_v36 = vand.u32 2147483648, %v3073_v25 }
 0x296   : > { %2497 = vrcp.f32 %v3080_v45  ;;  %vm1595_vm15 = vweird.f32 %v3080_v45 }
 0x297   : > { %v1403_v50 = vmul.f32 %v1387_v32, %v1371_v38  ;;  %v1397_v51 = vmul.f32 %v1381_v35, %v1365_v39  ;;  %v1623_v54 = vmul.f32 %v2490_v20, %v1622_v6  ;;  %v1376_v35 = vld [vmem:[%s2766_s16 + $0x10] sm:$0xff]  ;;  %v1644_v39 = vand.u32 2147483647, %v3073_v25 }
 0x299   : > { %v2494_v43 = vpop.eup %2493  ;;  %v2330_v55 = vmul.f32 -1.442695, %v1403_v50  ;;  %v2324_v59 = vmul.f32 -1.442695, %v1397_v51  ;;  %v1624_v60 = vadd.f32 %v2490_v20, %v1623_v54  ;;  %vm1645_vm9 = vcmp.eq.f32.partialorder %v1644_v39, 8.507059e+37 }
 0x29a   : > { %v2496_v1 = vpop.eup %2495  ;;  %v3083_v3 = vadd.f32 1.0, %v2494_v43 }
 0x29b   : > { %2499 = vpow2.f32 %v2330_v55  ;;  %v1628_v10 = vsel %vm1627_vm3, %v2490_v20, %v1624_v60  ;;  %v1636_v11 = vmul.f32 %v2496_v1, %v3073_v25  ;;  %vm1641_vm6 = vweird.f32 %v2496_v1 }
 0x29c   : > { %2501 = vrcp.f32 %v3083_v3  ;;  %v1351_v19 = vpop.xlane.xlu2 %1350  ;;  %v1327_v26 = vpop.xlane.xlu1 %1326  ;;  %v1633_v31 = vsel %vm1630_vm5, %v1632_v9, %v1628_v10  ;;  %vm1642_vm8 = vmor %vm1640_vm7, %vm1641_vm6  ;;  %v1647_v55 = vor.u32 1.1754944e-38, %v1646_v36  ;;  %v1389_v10 = vld [vmem:[%s2766_s16 + $0x78] sm:$0xff]  ;;  %vm1655_vm11 = vweird.f32 %v3083_v3 }
 0x29d   : > { %2503 = vpow2.f32 %v2324_v59  ;;  %v1372_v2 = vadd.f32 %v3063_v30, %v1351_v19  ;;  %v1360_v32 = vadd.f32 %v3063_v30, %v1327_v26  ;;  %1762 = vperm.xlu2 %2479, %v1633_v31   ;;  %v1637_v34 = vsub.f32 1.0, %v1636_v11  ;;  %v3093_v6 = vpop.eup %2497 }
 0x29e   : > { %v1591_v25 = vmul.f32 %v3093_v6, %v3080_v45  ;;  %vm1596_vm0 = vweird.f32 %v3093_v6 }
 0x29f   : > { %v1404_v20 = vmul.f32 %v1388_v18, %v1372_v2  ;;  %v1638_v38 = vmul.f32 %v2496_v1, %v1637_v34  ;;  %v1392_v50 = vmul.f32 %v1376_v35, %v1360_v32  ;;  %v1383_v18 = vld [vmem:[%s2766_s16 + $0x48] sm:$0xff]  ;;  %vm3160_vm5 = vmor %vm1595_vm15, %vm1596_vm0 }
 0x2a1   : > { %v2500_v46 = vpop.eup %2499  ;;  %v2331_v47 = vmul.f32 -1.442695, %v1404_v20  ;;  %v1639_v51 = vadd.f32 %v2496_v1, %v1638_v38  ;;  %v2319_v31 = vmul.f32 -1.442695, %v1392_v50  ;;  %v1659_v20 = vand.u32 2147483647, %v3083_v3 }
 0x2a2   : > { %v2502_v54 = vpop.eup %2501  ;;  %v3096_v43 = vadd.f32 1.0, %v2500_v46  ;;  %v1661_v38 = vand.u32 2147483648, %v3083_v3  ;;  %v1592_v50 = vsub.f32 1.0, %v1591_v25  ;;  %v1380_v25 = vld [vmem:[%s2766_s16 + $0x30] sm:$0xff] }
 0x2a3   : > { %v2504_v59 = vpop.eup %2503  ;;  %2505 = vpow2.f32 %v2331_v47  ;;  %v1643_v60 = vsel %vm1642_vm8, %v2496_v1, %v1639_v51  ;;  %v1651_v9 = vmul.f32 %v2502_v54, %v3083_v3  ;;  %v1375_v47 = vld [vmem:[%s2766_s16 + $0x8] sm:$0xff]  ;;  %vm1656_vm10 = vweird.f32 %v2502_v54 }
 0x2a4   : > { %2507 = vrcp.f32 %v3096_v43  ;;  %v1353_v11 = vpop.xlane.xlu0 %1352  ;;  %v1341_v19 = vpop.xlane.xlu2 %1340  ;;  %v1648_v26 = vsel %vm1645_vm9, %v1647_v55, %v1643_v60  ;;  %v3106_v35 = vadd.f32 1.0, %v2504_v59  ;;  %vm1657_vm12 = vmor %vm1655_vm11, %vm1656_vm10  ;;  %vm1660_vm13 = vcmp.eq.f32.partialorder %v1659_v20, 8.507059e+37 }
 0x2a5   : > { %v1373_v2 = vadd.f32 %v3063_v30, %v1353_v11  ;;  %v1367_v32 = vadd.f32 %v3063_v30, %v1341_v19  ;;  %v1325_v1 = vpop.xlane.xlu1 %1324  ;;  %1767 = vperm.xlu1 %2478, %v1648_v26   ;;  %v1652_v34 = vsub.f32 1.0, %v1651_v9  ;;  %2509 = vpow2.f32 %v2319_v31 }
 0x2a6   : > { %v1359_v36 = vadd.f32 %v3063_v30, %v1325_v1  ;;  %2511 = vrcp.f32 %v3106_v35  ;;  %v1676_v20 = vand.u32 2147483648, %v3096_v43  ;;  %vm1670_vm1 = vweird.f32 %v3096_v43 }
 0x2a7   : > { %v1405_v39 = vmul.f32 %v1389_v10, %v1373_v2  ;;  %v1399_v46 = vmul.f32 %v1383_v18, %v1367_v32  ;;  %v1653_v51 = vmul.f32 %v2502_v54, %v1652_v34  ;;  %v1662_v18 = vor.u32 1.1754944e-38, %v1661_v38  ;;  %v1378_v2 = vld [vmem:[%s2766_s16 + $0x20] sm:$0xff] }
 0x2a8   : > { %v1391_v10 = vmul.f32 %v1375_v47, %v1359_v36 }
 0x2a9   : > { %v2506_v55 = vpop.eup %2505  ;;  %v2332_v60 = vmul.f32 -1.442695, %v1405_v39  ;;  %v2326_v59 = vmul.f32 -1.442695, %v1399_v46  ;;  %v1654_v9 = vadd.f32 %v2502_v54, %v1653_v51  ;;  %v1593_v46 = vmul.f32 %v3093_v6, %v1592_v50 }
 0x2aa   : > { %v2508_v11 = vpop.eup %2507  ;;  %v3114_v19 = vadd.f32 1.0, %v2506_v55  ;;  %v2318_v38 = vmul.f32 -1.442695, %v1391_v10  ;;  %v1601_v10 = vand.u32 2147483648, %v3080_v45 }
 0x2ab   : > { %2513 = vpow2.f32 %v2332_v60  ;;  %v1658_v26 = vsel %vm1657_vm12, %v2502_v54, %v1654_v9  ;;  %v1666_v3 = vmul.f32 %v2508_v11, %v3096_v43  ;;  %v1674_v54 = vand.u32 2147483647, %v3096_v43  ;;  %v2510_v47 = vpop.eup %2509 }
 0x2ac   : > { %2515 = vrcp.f32 %v3114_v19  ;;  %v1335_v31 = vpop.xlane.xlu0 %1334  ;;  %v1331_v32 = vpop.xlane.xlu2 %1330  ;;  %v1663_v1 = vsel %vm1660_vm13, %v1662_v18, %v1658_v26  ;;  %vm1671_vm14 = vweird.f32 %v2508_v11  ;;  %vm1685_vm7 = vweird.f32 %v3114_v19 }
 0x2ad   : > { %2517 = vpow2.f32 %v2326_v59  ;;  %v1364_v34 = vadd.f32 %v3063_v30, %v1335_v31  ;;  %v1362_v39 = vadd.f32 %v3063_v30, %v1331_v32  ;;  %1772 = vperm.xlu1 %2478, %v1663_v1   ;;  %v1667_v36 = vsub.f32 1.0, %v1666_v3  ;;  %v3125_v9 = vpop.eup %2511  ;;  %vm3134_vm4 = vmor %vm1670_vm1, %vm1671_vm14 }
 0x2ae   : > { %v1599_v59 = vand.u32 2147483647, %v3080_v45  ;;  %2519 = vpow2.f32 %v2318_v38  ;;  %v1677_v32 = vor.u32 1.1754944e-38, %v1676_v20  ;;  %v1594_v1 = vadd.f32 %v3093_v6, %v1593_v46 }
 0x2af   : > { %v1396_v51 = vmul.f32 %v1380_v25, %v1364_v34  ;;  %v1394_v55 = vmul.f32 %v1378_v2, %v1362_v39  ;;  %v1668_v60 = vmul.f32 %v2508_v11, %v1667_v36  ;;  %vm1675_vm2 = vcmp.eq.f32.partialorder %v1674_v54, 8.507059e+37 }
 0x2b0   : > { %v3142_v36 = vadd.f32 1.0, %v2510_v47  ;;  %v1689_v54 = vand.u32 2147483647, %v3114_v19  ;;  %v1691_v47 = vand.u32 2147483648, %v3114_v19  ;;  %vm3167_vm6 = vcmp.eq.f32.partialorder %v1599_v59, 8.507059e+37 }
 0x2b1   : > { %v2514_v18 = vpop.eup %2513  ;;  %v2323_v26 = vmul.f32 -1.442695, %v1396_v51  ;;  %v2321_v3 = vmul.f32 -1.442695, %v1394_v55  ;;  %v1669_v31 = vadd.f32 %v2508_v11, %v1668_v60  ;;  %v1379_v51 = vld [vmem:[%s2766_s16 + $0x28] sm:$0xff]  ;;  %v1377_v60 = vld [vmem:[%s2766_s16 + $0x18] sm:$0xff]  ;;  %vm1580_vm1 = vweird.f32 %v3106_v35 }
 0x2b2   : > { %v2516_v50 = vpop.eup %2515  ;;  %v3132_v25 = vadd.f32 1.0, %v2514_v18  ;;  %vm1690_vm9 = vcmp.eq.f32.partialorder %v1689_v54, 8.507059e+37  ;;  %v1584_v54 = vand.u32 2147483647, %v3106_v35 }
 0x2b3   : > { %v2518_v34 = vpop.eup %2517  ;;  %2521 = vpow2.f32 %v2323_v26  ;;  %v1673_v39 = vsel %vm3134_vm4, %v2508_v11, %v1669_v31  ;;  %v1681_v43 = vmul.f32 %v2516_v50, %v3114_v19  ;;  %v1576_v31 = vmul.f32 %v3125_v9, %v3106_v35 }
 0x2b4   : > { %2523 = vrcp.f32 %v3132_v25  ;;  %v3145_v38 = vadd.f32 1.0, %v2518_v34  ;;  %v1333_v55 = vpop.xlane.xlu0 %1332  ;;  %v1329_v20 = vpop.xlane.xlu2 %1328  ;;  %v1678_v18 = vsel %vm1675_vm2, %v1677_v32, %v1673_v39  ;;  %vm1686_vm3 = vweird.f32 %v2516_v50 }
 0x2b5   : > { %2525 = vpow2.f32 %v2321_v3  ;;  %v1363_v46 = vadd.f32 %v3063_v30, %v1333_v55  ;;  %v1361_v26 = vadd.f32 %v3063_v30, %v1329_v20  ;;  %1777 = vperm.xlu0 %2477, %v1678_v18   ;;  %v1682_v11 = vsub.f32 1.0, %v1681_v43  ;;  %v2520_v32 = vpop.eup %2519  ;;  %vm1687_vm8 = vmor %vm1685_vm7, %vm1686_vm3 }
 0x2b6   : > { %2527 = vrcp.f32 %v3145_v38  ;;  %v1598_v39 = vsel %vm3160_vm5, %v3093_v6, %v1594_v1  ;;  %v1692_v6 = vor.u32 1.1754944e-38, %v1691_v47  ;;  %v1577_v59 = vsub.f32 1.0, %v1576_v31 }
 0x2b7   : > { %v1395_v2 = vmul.f32 %v1379_v51, %v1363_v46  ;;  %v1393_v34 = vmul.f32 %v1377_v60, %v1361_v26  ;;  %v1683_v14 = vmul.f32 %v2516_v50, %v1682_v11  ;;  %v1602_v51 = vor.u32 1.1754944e-38, %v1601_v10  ;;  %v1374_v11 = vld [vmem:[%s2766_s16] sm:$0xff] }
 0x2b8   : > { %2529 = vrcp.f32 %v3142_v36  ;;  %v1616_v31 = vand.u32 2147483648, %v3145_v38  ;;  %vm1700_vm10 = vweird.f32 %v3132_v25  ;;  %vm1610_vm13 = vweird.f32 %v3145_v38 }
 0x2b9   : > { %v2522_v55 = vpop.eup %2521  ;;  %v2322_v60 = vmul.f32 -1.442695, %v1395_v2  ;;  %v2320_v20 = vmul.f32 -1.442695, %v1393_v34  ;;  %v1684_v18 = vadd.f32 %v2516_v50, %v1683_v14  ;;  %v3185_v3 = vsel %vm3167_vm6, %v1602_v51, %v1598_v39 }
 0x2ba   : > { %v3172_v45 = vpop.eup %2523  ;;  %v3175_v46 = vadd.f32 1.0, %v2522_v55  ;;  %v1706_v39 = vand.u32 2147483648, %v3132_v25  ;;  %vm1581_vm2 = vweird.f32 %v3125_v9 }
 0x2bb   : > { %v2526_v1 = vpop.eup %2525  ;;  %2531 = vpow2.f32 %v2322_v60  ;;  %v1688_v26 = vsel %vm1687_vm8, %v2516_v50, %v1684_v18  ;;  %v1696_v10 = vmul.f32 %v3172_v45, %v3132_v25  ;;  %v1578_v60 = vmul.f32 %v3125_v9, %v1577_v59 }
 0x2bc   : > { %v2528_v14 = vpop.eup %2527  ;;  %2533 = vrcp.f32 %v3175_v46  ;;  %v3180_v19 = vadd.f32 1.0, %v2526_v1  ;;  %v1323_v2 = vpop.xlane.xlu0 %1322  ;;  %v1693_v34 = vsel %vm1690_vm9, %v1692_v6, %v1688_v26  ;;  %vm1701_vm11 = vweird.f32 %v3172_v45 }
 0x2bd   : > { %2535 = vpow2.f32 %v2320_v20  ;;  %v1358_v47 = vadd.f32 %v3063_v30, %v1323_v2  ;;  %1782 = vperm.xlu2 %2479, %v1693_v34   ;;  %v1606_v50 = vmul.f32 %v2528_v14, %v3145_v38  ;;  %v1697_v55 = vsub.f32 1.0, %v1696_v10  ;;  %vm1702_vm14 = vmor %vm1700_vm10, %vm1701_vm11 }
 0x2be   : > { %2537 = vrcp.f32 %v3180_v19  ;;  %v3195_v43 = vpop.eup %2529  ;;  %v3197_v30 = vadd.f32 1.0, %v2520_v32  ;;  %v1704_v20 = vand.u32 2147483647, %v3132_v25  ;;  %vm1611_vm12 = vweird.f32 %v2528_v14 }
 0x2bf   : > { %v1390_v18 = vmul.f32 %v1374_v11, %v1358_v47  ;;  %v1607_v6 = vsub.f32 1.0, %v1606_v50  ;;  %v1698_v51 = vmul.f32 %v3172_v45, %v1697_v55  ;;  %v1614_v59 = vand.u32 2147483647, %v3145_v38  ;;  %vm1612_vm15 = vmor %vm1610_vm13, %vm1611_vm12 }
 0x2c0   : > { %v1617_v34 = vor.u32 1.1754944e-38, %v1616_v31  ;;  %v1707_v55 = vor.u32 1.1754944e-38, %v1706_v39  ;;  %vm1705_vm0 = vcmp.eq.f32.partialorder %v1704_v20, 8.507059e+37  ;;  %vm1565_vm6 = vweird.f32 %v3175_v46  ;;  %vm3244_vm12 = vmor %vm1580_vm1, %vm1581_vm2 }
 0x2c1   : > { %v2532_v1 = vpop.eup %2531  ;;  %v2317_v26 = vmul.f32 -1.442695, %v1390_v18  ;;  %v1608_v10 = vmul.f32 %v2528_v14, %v1607_v6  ;;  %v1699_v32 = vadd.f32 %v3172_v45, %v1698_v51  ;;  %vm1615_vm4 = vcmp.eq.f32.partialorder %v1614_v59, 8.507059e+37 }
 0x2c2   : > { %v2534_v11 = vpop.eup %2533  ;;  %v3203_v2 = vadd.f32 1.0, %v2532_v1  ;;  %v1569_v59 = vand.u32 2147483647, %v3175_v46  ;;  %vm1535_vm7 = vweird.f32 %v3180_v19  ;;  %vm1585_vm13 = vcmp.eq.f32.partialorder %v1584_v54, 8.507059e+37 }
 0x2c3   : > { %v2536_v47 = vpop.eup %2535  ;;  %2539 = vpow2.f32 %v2317_v26  ;;  %v1609_v50 = vadd.f32 %v2528_v14, %v1608_v10  ;;  %v1561_v18 = vmul.f32 %v2534_v11, %v3175_v46  ;;  %v1703_v38 = vsel %vm1702_vm14, %v3172_v45, %v1699_v32 }
 0x2c4   : > { %v2538_v6 = vpop.eup %2537  ;;  %2541 = vrcp.f32 %v3203_v2  ;;  %v3213_v1 = vadd.f32 1.0, %v2536_v47  ;;  %v1708_v51 = vsel %vm1705_vm0, %v1707_v55, %v1703_v38  ;;  %v1586_v10 = vand.u32 2147483648, %v3106_v35 }
 0x2c5   : > { %v1613_v31 = vsel %vm1612_vm15, %v2528_v14, %v1609_v50  ;;  %v1531_v25 = vmul.f32 %v2538_v6, %v3180_v19  ;;  %1787 = vperm.xlu0 %2477, %v1708_v51   ;;  %v1562_v26 = vsub.f32 1.0, %v1561_v18  ;;  %v1571_v45 = vand.u32 2147483648, %v3175_v46 }
 0x2c6   : > { %2543 = vrcp.f32 %v3213_v1  ;;  %v1618_v39 = vsel %vm1615_vm4, %v1617_v34, %v1613_v31  ;;  %v1541_v14 = vand.u32 2147483648, %v3180_v19  ;;  %vm1566_vm3 = vweird.f32 %v2534_v11 }
 0x2c7   : > { %2545 = vrcp.f32 %v3197_v30  ;;  %1757 = vperm.xlu2 %2479, %v1618_v39   ;;  %v1532_v47 = vsub.f32 1.0, %v1531_v25  ;;  %v1563_v20 = vmul.f32 %v2534_v11, %v1562_v26  ;;  %vm1536_vm5 = vweird.f32 %v2538_v6  ;;  %vm1567_vm8 = vmor %vm1565_vm6, %vm1566_vm3 }
 0x2c8   : > { %v1539_v50 = vand.u32 2147483647, %v3180_v19  ;;  %v1579_v55 = vadd.f32 %v3125_v9, %v1578_v60  ;;  %v1501_v51 = vmul.f32 %v3195_v43, %v3142_v36  ;;  %v1572_v39 = vor.u32 1.1754944e-38, %v1571_v45  ;;  %vm1537_vm9 = vmor %vm1535_vm7, %vm1536_vm5 }
 0x2c9   : > { %v2540_v32 = vpop.eup %2539  ;;  %v1533_v34 = vmul.f32 %v2538_v6, %v1532_v47  ;;  %v1564_v31 = vadd.f32 %v2534_v11, %v1563_v20  ;;  %v1542_v60 = vor.u32 1.1754944e-38, %v1541_v14  ;;  %vm1570_vm10 = vcmp.eq.f32.partialorder %v1569_v59, 8.507059e+37 }
 0x2ca   : > { %v2542_v18 = vpop.eup %2541  ;;  %v3228_v38 = vadd.f32 1.0, %v2540_v32  ;;  %vm1540_vm11 = vcmp.eq.f32.partialorder %v1539_v50, 8.507059e+37  ;;  %v1502_v14 = vsub.f32 1.0, %v1501_v51  ;;  %v1556_v50 = vand.u32 2147483648, %v3203_v2 }
 0x2cb   : > { %v1534_v25 = vadd.f32 %v2538_v6, %v1533_v34  ;;  %v1546_v26 = vmul.f32 %v2542_v18, %v3203_v2  ;;  %v1568_v32 = vsel %vm1567_vm8, %v2534_v11, %v1564_v31  ;;  %v1587_v31 = vor.u32 1.1754944e-38, %v1586_v10 }
 0x2cc   : > { %v2544_v47 = vpop.eup %2543  ;;  %2547 = vrcp.f32 %v3228_v38  ;;  %v1573_v33 = vsel %vm1570_vm10, %v1572_v39, %v1568_v32  ;;  %vm1551_vm14 = vweird.f32 %v2542_v18  ;;  %vm1550_vm0 = vweird.f32 %v3203_v2 }
 0x2cd   : > { %v3237_v20 = vpop.eup %2545  ;;  %v1538_v46 = vsel %vm1537_vm9, %v2538_v6, %v1534_v25  ;;  %v1516_v34 = vmul.f32 %v2544_v47, %v3213_v1  ;;  %1742 = vperm.xlu1 %2478, %v1573_v33   ;;  %1752 = vperm.xlu0 %2477, %v3185_v3   ;;  %v1547_v11 = vsub.f32 1.0, %v1546_v26  ;;  %v1583_v6 = vsel %vm3244_vm12, %v3125_v9, %v1579_v55  ;;  %vm1552_vm4 = vmor %vm1550_vm0, %vm1551_vm14 }
 0x2ce   : > { %v1543_v45 = vsel %vm1540_vm11, %v1542_v60, %v1538_v46  ;;  %v1526_v25 = vand.u32 2147483648, %v3213_v1  ;;  %v1554_v33 = vand.u32 2147483647, %v3203_v2  ;;  %vm1521_vm15 = vweird.f32 %v2544_v47 }
 0x2cf   : > { %1732 = vperm.xlu2 %2479, %v1543_v45   ;;  %v1517_v59 = vsub.f32 1.0, %v1516_v34  ;;  %v1548_v39 = vmul.f32 %v2542_v18, %v1547_v11  ;;  %v1524_v26 = vand.u32 2147483647, %v3213_v1  ;;  %v1588_v9 = vsel %vm1585_vm13, %v1587_v31, %v1583_v6 }
 0x2d0   : > { %v1503_v60 = vmul.f32 %v3195_v43, %v1502_v14  ;;  %v1486_v35 = vmul.f32 %v3237_v20, %v3197_v30  ;;  %vm1520_vm1 = vweird.f32 %v3213_v1  ;;  %v1557_v10 = vor.u32 1.1754944e-38, %v1556_v50 }
 0x2d1   : > { %v1518_v3 = vmul.f32 %v2544_v47, %v1517_v59  ;;  %v1549_v51 = vadd.f32 %v2542_v18, %v1548_v39  ;;  %vm1522_vm2 = vmor %vm1520_vm1, %vm1521_vm15  ;;  %v1527_v46 = vor.u32 1.1754944e-38, %v1526_v25  ;;  %vm1555_vm3 = vcmp.eq.f32.partialorder %v1554_v33, 8.507059e+37 }
 0x2d2   : > { %v2548_v55 = vpop.eup %2547  ;;  %vm1506_vm5 = vweird.f32 %v3195_v43  ;;  %vm1525_vm6 = vcmp.eq.f32.partialorder %v1524_v26, 8.507059e+37  ;;  %v1504_v6 = vadd.f32 %v3195_v43, %v1503_v60  ;;  %v1481_v1 = vand.u32 2147483648, %v3228_v38 }
 0x2d3   : > { %v1519_v54 = vadd.f32 %v2544_v47, %v1518_v3  ;;  %v1471_v32 = vmul.f32 %v2548_v55, %v3228_v38  ;;  %v1553_v34 = vsel %vm1552_vm4, %v2542_v18, %v1549_v51  ;;  %v1487_v14 = vsub.f32 1.0, %v1486_v35 }
 0x2d4   : > { %v1558_v2 = vsel %vm1555_vm3, %v1557_v10, %v1553_v34  ;;  %v1511_v59 = vand.u32 2147483648, %v3142_v36  ;;  %vm1476_vm7 = vweird.f32 %v2548_v55  ;;  %v1479_v18 = vand.u32 2147483647, %v3228_v38 }
 0x2d5   : > { %v1523_v19 = vsel %vm1522_vm2, %v2544_v47, %v1519_v54  ;;  %v1472_v45 = vsub.f32 1.0, %v1471_v32  ;;  %1737 = vperm.xlu1 %2478, %v1558_v2   ;;  %1747 = vperm.xlu0 %2477, %v1588_v9   ;;  %vm1505_vm8 = vweird.f32 %v3142_v36  ;;  %v1509_v47 = vand.u32 2147483647, %v3142_v36 }
 0x2d6   : > { %v1528_v11 = vsel %vm1525_vm6, %v1527_v46, %v1523_v19  ;;  %vm1507_vm9 = vmor %vm1505_vm8, %vm1506_vm5  ;;  %vm1475_vm10 = vweird.f32 %v3228_v38  ;;  %v1482_v39 = vor.u32 1.1754944e-38, %v1481_v1  ;;  %v1488_v33 = vmul.f32 %v3237_v20, %v1487_v14 }
 0x2d7   : > { %1727 = vperm.xlu2 %2479, %v1528_v11   ;;  %v1473_v50 = vmul.f32 %v2548_v55, %v1472_v45  ;;  %v1508_v25 = vsel %vm1507_vm9, %v3195_v43, %v1504_v6  ;;  %vm1477_vm11 = vmor %vm1475_vm10, %vm1476_vm7  ;;  %v1512_v3 = vor.u32 1.1754944e-38, %v1511_v59  ;;  %vm1480_vm12 = vcmp.eq.f32.partialorder %v1479_v18, 8.507059e+37 }
 0x2d8   : > { %vm1510_vm13 = vcmp.eq.f32.partialorder %v1509_v47, 8.507059e+37  ;;  %v1489_v36 = vadd.f32 %v3237_v20, %v1488_v33  ;;  %vm1491_vm14 = vweird.f32 %v3237_v20  ;;  %v1496_v38 = vand.u32 2147483648, %v3197_v30  ;;  %v1830_v47 = vld [vmem:[#allocation3] sm:$0xff] }
 0x2d9   : > { %v1474_v31 = vadd.f32 %v2548_v55, %v1473_v50  ;;  %v1513_v51 = vsel %vm1510_vm13, %v1512_v3, %v1508_v25  ;;  %vm1490_vm15 = vweird.f32 %v3197_v30  ;;  %v1494_v43 = vand.u32 2147483647, %v3197_v30 }
 0x2da   : > { %vm1492_vm0 = vmor %vm1490_vm15, %vm1491_vm14  ;;  %v3457_v18 = vmax.f32 %v3051_v29, 0.0 }
 0x2db   : > { %v1478_v26 = vsel %vm1477_vm11, %v2548_v55, %v1474_v31  ;;  %v1493_v60 = vsel %vm1492_vm0, %v3237_v20, %v1489_v36  ;;  %v1497_v55 = vor.u32 1.1754944e-38, %v1496_v38  ;;  %vm1495_vm1 = vcmp.eq.f32.partialorder %v1494_v43, 8.507059e+37 }
 0x2dc   : > { %v1483_v9 = vsel %vm1480_vm12, %v1482_v39, %v1478_v26  ;;  %v1831_v39 = vld [vmem:[#allocation3 + $0x8] sm:$0xff] }
 0x2dd   : > { %1722 = vperm.xlu0 %2477, %v1513_v51   ;;  %1712 = vperm.xlu1 %2478, %v1483_v9   ;;  %v1498_v35 = vsel %vm1495_vm1, %v1497_v55, %v1493_v60 }
 0x2e5   : > { %1717 = vperm.xlu0 %2477, %v1498_v35  }
 0x2f7   : > { %v1763_v54 = vpop.permute.xlu2 %1762 }
 0x2f8   : > { %v1800_v5 = vmul.f32 %v1763_v54, %v1296_v49 }
 0x317   : > { %v1768_v10 = vpop.permute.xlu1 %1767  ;;  %v1783_v32 = vpop.permute.xlu2 %1782 }
 0x318   : > { %v1804_v2 = vmul.f32 %v1783_v32, %v1300_v7  ;;  %v1801_v1 = vmul.f32 %v1768_v10, %v1297_v53 }
 0x31a   : > { %v1811_v62 = vpack.c.bf16 %v1801_v1, %v1800_v5 }
 0x31f   : > { %v1773_v34 = vpop.permute.xlu1 %1772 }
 0x320   : > { %v1802_v6 = vmul.f32 %v1773_v34, %v1298_v57 }
 0x321   : > { %v1758_v30 = vpop.permute.xlu2 %1757 }
 0x322   : > { %v1799_v56 = vmul.f32 %v1758_v30, %v1295_v12 }
 0x327   : > { %v1778_v46 = vpop.permute.xlu0 %1777 }
 0x328   : > { %v1803_v20 = vmul.f32 %v1778_v46, %v1299_v63 }
 0x329   : > { %v1733_v63 = vpop.permute.xlu2 %1732 }
 0x32a   : > { %v1812_v14 = vpack.c.bf16 %v1803_v20, %v1802_v6  ;;  %v1794_v49 = vmul.f32 %v1733_v63, %v1290_v21 }
 0x331   : > { %v1728_v8 = vpop.permute.xlu2 %1727 }
 0x332   : > { %v1793_v17 = vmul.f32 %v1728_v8, %v1289_v27  ;;  %v3458_v27 = vmax.f32 %v3009_v44, 0.0 }
 0x337   : > { %v1788_v19 = vpop.permute.xlu0 %1787 }
 0x338   : > { %v1805_v45 = vmul.f32 %v1788_v19, %v1301_v15 }
 0x33a   : > { %v1813_v11 = vpack.c.bf16 %v1805_v45, %v1804_v2 }
 0x33c   : > { %1832 = vmatpush.bf16.msrb.mxu3 %v1813_v11 }
 0x33f   : > { %v1743_v59 = vpop.permute.xlu1 %1742  ;;  %v1753_v50 = vpop.permute.xlu0 %1752 }
 0x340   : > { %1833 = vmatpush.bf16.msrb.mxu3 %v1812_v14  ;;  %v1798_v7 = vmul.f32 %v1753_v50, %v1294_v42  ;;  %v1796_v53 = vmul.f32 %v1743_v59, %v1292_v22 }
 0x342   : > { %v1810_v57 = vpack.c.bf16 %v1799_v56, %v1798_v7 }
 0x344   : > { %1834 = vmatpush.bf16.msrb.mxu3 %v1811_v62 }
 0x347   : > { %v1738_v13 = vpop.permute.xlu1 %1737  ;;  %v1748_v52 = vpop.permute.xlu0 %1747 }
 0x348   : > { %v1797_v48 = vmul.f32 %v1748_v52, %v1293_v61  ;;  %1835 = vmatpush.bf16.msrb.mxu3 %v1810_v57  ;;  %v1795_v41 = vmul.f32 %v1738_v13, %v1291_v28  ;;  %v1815_v61 = vshrl.u32 %v720_v37, 7  ;;  %v2616_v37 = vmov 1.0|1.0  }
 0x34a   : > { %v1809_v42 = vpack.c.bf16 %v1797_v48, %v1796_v53  ;;  %v1808_v12 = vpack.c.bf16 %v1795_v41, %v1794_v49  ;;  %v1816_v28 = vadd.s32 8, %v1815_v61  ;;  %vm1823_vm4 = vcmp.eq.s32.totalorder %v1815_v61, %v2484_v16 }
 0x34c   : > { %1836 = vmatpush.bf16.msrb.mxu3 %v1809_v42  ;;  %vm1824_vm2 = vcmp.eq.s32.totalorder %v1816_v28, %v2484_v16 }
 0x34d   : > { %vm2335_vm3 = vmpackc.low %vm1824_vm2, %vm1823_vm4 }
 0x34f   : > { %v1723_v15 = vpop.permute.xlu0 %1722  ;;  %v1713_v24 = vpop.permute.xlu1 %1712 }
 0x350   : > { %v1792_v58 = vmul.f32 %v1723_v15, %v1288_v4  ;;  %1837 = vmatpush.bf16.msrb.mxu3 %v1808_v12  ;;  %v1790_v23 = vmul.f32 %v1713_v24, %v3457_v18 }
 0x352   : > { %v1807_v22 = vpack.c.bf16 %v1793_v17, %v1792_v58 }
 0x354   : > { %1838 = vmatpush.bf16.msrb.mxu3 %v1807_v22 }
 0x357   : > { %v1718_v21 = vpop.permute.xlu0 %1717 }
 0x358   : > { %v1791_v0 = vmul.f32 %v1718_v21, %v3458_v27 }
 0x35a   : > { %v1806_v4 = vpack.c.bf16 %v1791_v0, %v1790_v23 }
 0x35c   : > { %1839 = vmatpush.bf16.msrb.mxu3 %v1806_v4 }
 0x35f   : > { %2336 = vmatmul.msk.bf16.vlgmr.msrb.gmra.mxu3 %vm2335_vm3, %v2616_v37 }
 0x3e2   : > { %v1841_v31 = vpop.f32.mrf.mxu3 }
 0x3e3   : > { %v1846_v25 = vadd.f32 %v1841_v31, %v1830_v47 }
 0x3e5   : > { %1848 = vst [vmem:[#allocation3] sm:$0xff] %v1846_v25 }
 0x3e9   : > { %1853 = sbr.rel (%p2337_p7) target bundleno = 1586 (0x632), region = 104 }
 0x3ea   : > { %v1843_v33 = vpop.f32.mrf.mxu3 }
 0x3eb   : > { %v1847_v3 = vadd.f32 %v1843_v33, %v1831_v39 }
 0x3ed   : > { %1849 = vst [vmem:[#allocation3 + $0x8] sm:$0xff] %v1847_v3 }
 0x3ee   : > { %v2423_v44 = vld [vmem:[%s3419_s11 + $0x38] sm:$0xff]  ;;  %v2422_v29 = vld [vmem:[%s3419_s11 + $0x30] sm:$0xff]  ;;  %v2421_v51 = vld [vmem:[%s3419_s11 + $0x28] sm:$0xff]  ;;  %vm2038_vm5 = vcmp.lt.s32.totalorder %v2808_v40, 32 }
 0x3ef   : > { %1923 = vmatpush.bf16.msra.mxu0 %v2423_v44  ;;  %v2431_v26 = vld [vmem:[%s3421_s13 + $0x38] sm:$0xff]  ;;  %v2430_v9 = vld [vmem:[%s3421_s13 + $0x30] sm:$0xff]  ;;  %v2429_v36 = vld [vmem:[%s3421_s13 + $0x28] sm:$0xff] }
 0x3f0   : > { %2014 = vmatpush.bf16.msra.mxu1 %v2431_v26  ;;  %v2420_v38 = vld [vmem:[%s3419_s11 + $0x20] sm:$0xff]  ;;  %v2419_v60 = vld [vmem:[%s3419_s11 + $0x18] sm:$0xff]  ;;  %v2418_v55 = vld [vmem:[%s3419_s11 + $0x10] sm:$0xff] }
 0x3f1   : > { %v2428_v43 = vld [vmem:[%s3421_s13 + $0x20] sm:$0xff]  ;;  %v2417_v35 = vld [vmem:[%s3419_s11 + $0x8] sm:$0xff]  ;;  %v2427_v34 = vld [vmem:[%s3421_s13 + $0x18] sm:$0xff] }
 0x3f2   : > { %v2416_v54 = vld [vmem:[%s3419_s11] sm:$0xff]  ;;  %v2426_v19 = vld [vmem:[%s3421_s13 + $0x10] sm:$0xff]  ;;  %v2425_v2 = vld [vmem:[%s3421_s13 + $0x8] sm:$0xff] }
 0x3f3   : > { %1924 = vmatpush.bf16.msra.mxu0 %v2422_v29  ;;  %v1854_v10 = vld [vmem:[#allocation3] sm:$0xff]  ;;  %v2549_v6 = vld [vmem:[%s3420_s12] ss:$0 sm:$0xff] }
 0x3f4   : > { %2015 = vmatpush.bf16.msra.mxu1 %v2430_v9  ;;  %v1855_v32 = vld [vmem:[#allocation3 + $0x8] sm:$0xff]  ;;  %v2424_v45 = vld [vmem:[%s3421_s13] sm:$0xff] }
 0x3f5   : > { %v1856_v46 = vpack.c.bf16 %v1855_v32, %v1854_v10  ;;  %v1873_v20 = vld [vmem:[%s3423_s15] sm:$0xff]  ;;  %v1874_v1 = vld [vmem:[%s3423_s15 + $0x8] sm:$0xff] }
 0x3f6   : > { %v2550_v56 = vld [vmem:[%s3422_s14] ss:$0 sm:$0xff]  ;;  %v2029_v41 = vld [vmem:[%s3459_s28 + $0x8] sm:$0xff] }
 0x3f7   : > { %1925 = vmatpush.bf16.msra.mxu0 %v2421_v51  ;;  %v2028_v13 = vld [vmem:[%s3459_s28] sm:$0xff] }
 0x3f8   : > { %2016 = vmatpush.bf16.msra.mxu1 %v2429_v36  ;;  %v2551_v44 = vld [vmem:[%s3460_s18] ss:$0 sm:$0xff] }
 0x3f9   : > { %v2552_v9 = vld [vmem:[%s3461_s1] ss:$0 sm:$0xff] }
 0x3fb   : > { %1926 = vmatpush.bf16.msra.mxu0 %v2420_v38 }
 0x3fc   : > { %2017 = vmatpush.bf16.msra.mxu1 %v2428_v43 }
 0x3ff   : > { %1927 = vmatpush.bf16.msra.mxu0 %v2419_v60 }
 0x400   : > { %2018 = vmatpush.bf16.msra.mxu1 %v2427_v34 }
 0x403   : > { %1928 = vmatpush.bf16.msra.mxu0 %v2418_v55 }
 0x404   : > { %2019 = vmatpush.bf16.msra.mxu1 %v2426_v19 }
 0x407   : > { %1929 = vmatpush.bf16.msra.mxu0 %v2417_v35 }
 0x408   : > { %2020 = vmatpush.bf16.msra.mxu1 %v2425_v2 }
 0x40b   : > { %1930 = vmatpush.bf16.msra.mxu0 %v2416_v54 }
 0x40c   : > { %2021 = vmatpush.bf16.msra.mxu1 %v2424_v45 }
 0x40e   : > { %1931 = vmatmul.bf16.vlgmr.msra.gmra.mxu0 %v1856_v46 }
 0x48b   : > { %v1932_v30 = vpop.f32.mrf.mxu0 }
 0x48c   : > { %v1933_v11 = vadd.f32 %v1932_v30, %v1873_v20 }
 0x48e   : > { %v1941_v59 = vadd.f32 %v2549_v6, %v1933_v11 }
 0x490   : > { %v1943_v7 = vmax.f32 %v1941_v59, 0.0 }
 0x493   : > { %v1934_v14 = vpop.f32.mrf.mxu0 }
 0x494   : > { %v1935_v50 = vadd.f32 %v1934_v14, %v1874_v1 }
 0x496   : > { %v1942_v5 = vadd.f32 %v2549_v6, %v1935_v50 }
 0x498   : > { %v1944_v62 = vmax.f32 %v1942_v5, 0.0 }
 0x49a   : > { %v1945_v63 = vpack.c.bf16 %v1944_v62, %v1943_v7 }
 0x49c   : > { %2022 = vmatmul.bf16.vlgmr.msra.gmra.mxu1 %v1945_v63 }
 0x519   : > { %v2023_v57 = vpop.f32.mrf.mxu1 }
 0x51a   : > { %v2024_v52 = vadd.f32 %v2550_v56, %v2023_v57 }
 0x51c   : > { %v2030_v53 = vadd.f32 %v2028_v13, %v2024_v52 }
 0x51e   : > { %2032 = vadd.xlane.f32.xlu0 %v2030_v53 }
 0x521   : > { %v2025_v48 = vpop.f32.mrf.mxu1 }
 0x522   : > { %v2026_v42 = vadd.f32 %v2550_v56, %v2025_v48 }
 0x524   : > { %v2031_v49 = vadd.f32 %v2029_v41, %v2026_v42 }
 0x526   : > { %2034 = vadd.xlane.f32.xlu0 %v2031_v49 }
 0x591   : > { %v2033_v8 = vpop.xlane.xlu0 %2032 }
 0x592   : > { %v2036_v12 = vmul.f32 0.03125, %v2033_v8 }
 0x594   : > { %v2039_v15 = vsub.f32 %v2030_v53, %v2036_v12 }
 0x596   : > { %v2041_v17 = vsel %vm2038_vm5, %v2039_v15, 0.0 }
 0x597   : > { %v2043_v58 = vmul.f32 %v2041_v17, %v2041_v17 }
 0x599   : > { %2045 = vadd.xlane.f32.xlu1 %v2043_v58  ;;  %v2035_v61 = vpop.xlane.xlu0 %2034 }
 0x59a   : > { %v2037_v22 = vmul.f32 0.03125, %v2035_v61 }
 0x59c   : > { %v2040_v24 = vsub.f32 %v2031_v49, %v2037_v22 }
 0x59e   : > { %v2042_v28 = vsel %vm2038_vm5, %v2040_v24, 0.0 }
 0x59f   : > { %v2044_v16 = vmul.f32 %v2042_v28, %v2042_v28 }
 0x5a1   : > { %2047 = vadd.xlane.f32.xlu1 %v2044_v16 }
 0x60c   : > { %v2046_v21 = vpop.xlane.xlu1 %2045 }
 0x60d   : > { %v2049_v18 = vmul.f32 0.03125, %v2046_v21 }
 0x60f   : > { %v2051_v23 = vadd.f32 1e-05, %v2049_v18 }
 0x611   : > { %2553 = vrsqrt.f32 %v2051_v23  ;;  %vm2059_vm7 = vweird.f32 %v2051_v23 }
 0x614   : > { %v2048_v27 = vpop.xlane.xlu1 %2047 }
 0x615   : > { %v2050_v0 = vmul.f32 0.03125, %v2048_v27 }
 0x617   : > { %v2554_v4 = vpop.eup %2553  ;;  %v2052_v37 = vadd.f32 1e-05, %v2050_v0 }
 0x618   : > { %v2054_v47 = vmul.f32 %v2554_v4, %v2051_v23  ;;  %vm2060_vm6 = vweird.f32 %v2554_v4 }
 0x619   : > { %2555 = vrsqrt.f32 %v2052_v37  ;;  %vm2061_vm8 = vmor %vm2059_vm7, %vm2060_vm6  ;;  %vm2069_vm10 = vweird.f32 %v2052_v37 }
 0x61a   : > { %v2055_v40 = vmul.f32 %v2554_v4, %v2054_v47 }
 0x61c   : > { %v2056_v31 = vmul.f32 0.5, %v2055_v40 }
 0x61e   : > { %v2057_v25 = vsub.f32 1.5, %v2056_v31 }
 0x61f   : > { %v2556_v39 = vpop.eup %2555 }
 0x620   : > { %v2058_v33 = vmul.f32 %v2554_v4, %v2057_v25  ;;  %v2064_v3 = vmul.f32 %v2556_v39, %v2052_v37  ;;  %vm2070_vm9 = vweird.f32 %v2556_v39 }
 0x621   : > { %vm2071_vm11 = vmor %vm2069_vm10, %vm2070_vm9 }
 0x622   : > { %v2062_v29 = vsel %vm2061_vm8, %v2554_v4, %v2058_v33  ;;  %v2065_v26 = vmul.f32 %v2556_v39, %v2064_v3 }
 0x623   : > { %v2073_v51 = vmul.f32 %v2062_v29, %v2041_v17 }
 0x624   : > { %v2066_v36 = vmul.f32 0.5, %v2065_v26 }
 0x625   : > { %v2079_v38 = vmul.f32 %v2551_v44, %v2073_v51 }
 0x626   : > { %v2067_v43 = vsub.f32 1.5, %v2066_v36 }
 0x627   : > { %v2085_v60 = vadd.f32 %v2552_v9, %v2079_v38 }
 0x628   : > { %v2068_v55 = vmul.f32 %v2556_v39, %v2067_v43 }
 0x629   : > { %2087 = vst [vmem:[#allocation3] sm:$0xff] %v2085_v60 }
 0x62a   : > { %v2072_v35 = vsel %vm2071_vm11, %v2556_v39, %v2068_v55 }
 0x62b   : > { %v2074_v54 = vmul.f32 %v2072_v35, %v2042_v28 }
 0x62d   : > { %v2080_v10 = vmul.f32 %v2551_v44, %v2074_v54 }
 0x62f   : > { %v2086_v32 = vadd.f32 %v2552_v9, %v2080_v10 }
 0x631   : > { %2088 = vst [vmem:[#allocation3 + $0x8] sm:$0xff] %v2086_v32 }
 0x632 PF: > { %s3462_s19 = sld [smem:[#allocation7_spill]]  ;;  %s2617_s16 = smov [#allocation3]  }
 0x633   : > { %s3464_s24 = sld [smem:[#allocation16_spill]]  ;;  %s2097_s3 = sshll.u32 %s2617_s16, 4  ;;  %s2098_s3 = int_to_ptr.vmem [resolvable:$true] %s2097_s3 }
 0x634   : > { %s2618_s27 = smov 128   ;;  %s2619_s23 = smov 8  }
 0x638   : > { %s3463_s10 = sadd.s32 4294967295, %s3462_s19  }
 0x639   : > { %p2444_p8 = scmp.eq.s32.totalorder %s3463_s10, 2  ;;  %s2099_s25 = sshll.u32 %s3464_s24, 4  ;;  %s2100_s25 = int_to_ptr.hbm [resolvable:$true] %s2099_s25 }
 0x63b   : > { %2441 = dma.vmem_to_hbm [thread:$0]  (%p2444_p8), %s2098_s3, 256, %s2100_s25, [#allocation4], %s2618_s27, %s2618_s27, %s2619_s23  }
 0x63c   : > { %2598 = dma.done.wait (%p2444_p8), [#allocation4], 256  }
 0x63d   : > { %2600 = vsyncadd (%p2444_p8), [#allocation4], 4294967040 }
 0x63e PF: > { %s3465_s26 = sld [smem:[#allocation7_spill]] }
 0x63f   : > { %s3466_s20 = sld [smem:[#allocation6_spill]] }
 0x640   : > { %s3467_s21 = sld [smem:[#allocation8_spill]] }
 0x644   : > { %s32_s1 = sadd.s32 1, %s3465_s26  }
 0x645   : > { %p29_p9 = scmp.ge.s32.totalorder %s32_s1, 5  }
 0x647   :  { %31 = sbr.rel (!%p29_p9) target bundleno = 11 (0xb), region = 147 }
 0x64c   :  { %2116 = vsyncpa [#allocation4], 1 }
 0x64d   :  { %2118 = vsyncpa [#allocation4 + $0x1], 1 }

</bundles_post_ra>
